<compile_context>
chip_gen: v6e
topology: v6e:2x2x1
jax: 0.10.0
libtpu: 0.0.40
codegen_flags: <defaults>
</compile_context>

<pallas_src>
import functools
import math

import jax
import jax.numpy as jnp
from jax.experimental import pallas as pl
from jax.experimental.pallas import tpu as pltpu


_VMEM_LIMIT_BYTES = 64 * 1024 * 1024   # raised scoped-VMEM limit (fits all generations)
_VMEM_TILE_BUDGET = 40 * 1024 * 1024   # budget for one call's resident + pipelined tiles
_INV_SQRT2 = 1.0 / math.sqrt(2.0)
_LN_EPS = 1e-5


# ----------------------------- tiling helpers --------------------------------

def _round_up(x, m):
    return (x + m - 1) // m * m


def _col_tile(N):
    """Lane-dense output tile: full N for small layers, 512-lane tiles for big N."""
    if N > 1024 and N % 512 == 0:
        return 512
    return N


def _row_tile(M, per_row_elems, resident_elems=0, *, max_rows=512):
    """Largest multiple-of-8 row tile keeping double-buffered tiles under budget."""
    budget_elems = _VMEM_TILE_BUDGET // 4              # f32 elements
    avail = budget_elems - 2 * resident_elems          # weight tile is double-buffered
    avail = max(avail, 16 * per_row_elems)             # never drop below an 8-row tile
    tm = min(max_rows, avail // (2 * per_row_elems), _round_up(M, 8))
    return max(8, (tm // 8) * 8)


def _pad_rows(x, tm):
    M = x.shape[0]
    Mp = _round_up(M, tm)
    if Mp != M:
        x = jnp.pad(x, ((0, Mp - M), (0, 0)))
    return x


def _compiler_params(n_axes):
    return pltpu.CompilerParams(
        dimension_semantics=("parallel",) * n_axes,
        vmem_limit_bytes=_VMEM_LIMIT_BYTES)


def _gelu(x):
    # exact (erf-based) GELU to match PyTorch nn.GELU default
    return 0.5 * x * (1.0 + jax.lax.erf(x * _INV_SQRT2))


# ----------------------------- Pallas kernels --------------------------------

def _linear_kernel(x_ref, w_ref, b_ref, o_ref, *, apply_gelu):
    acc = jnp.dot(x_ref[...], w_ref[...], preferred_element_type=jnp.float32)
    acc = acc + b_ref[...]
    if apply_gelu:
        acc = _gelu(acc)
    o_ref[...] = acc.astype(o_ref.dtype)


def _ln_linear_kernel(x_ref, g_ref, bln_ref, w_ref, b_ref, o_ref, *, eps, apply_gelu):
    # LayerNorm (f32 statistics) fused with the following projection (+ optional GELU).
    x = x_ref[...].astype(jnp.float32)
    mean = jnp.mean(x, axis=-1, keepdims=True)
    var = jnp.mean(jnp.square(x - mean), axis=-1, keepdims=True)
    xn = (x - mean) * jax.lax.rsqrt(var + eps) * g_ref[...] + bln_ref[...]
    acc = jnp.dot(xn.astype(w_ref.dtype), w_ref[...],
                  preferred_element_type=jnp.float32) + b_ref[...]
    if apply_gelu:
        acc = _gelu(acc)
    o_ref[...] = acc.astype(o_ref.dtype)


def _linear_residual_kernel(x_ref, w_ref, b_ref, r_ref, o_ref):
    acc = jnp.dot(x_ref[...], w_ref[...], preferred_element_type=jnp.float32)
    acc = acc + b_ref[...] + r_ref[...].astype(jnp.float32)
    o_ref[...] = acc.astype(o_ref.dtype)


def _layernorm_kernel(x_ref, g_ref, b_ref, o_ref, *, eps):
    x = x_ref[...].astype(jnp.float32)
    mean = jnp.mean(x, axis=-1, keepdims=True)
    var = jnp.mean(jnp.square(x - mean), axis=-1, keepdims=True)
    y = (x - mean) * jax.lax.rsqrt(var + eps)
    o_ref[...] = (y * g_ref[...] + b_ref[...]).astype(o_ref.dtype)


def _attention_kernel(q_ref, k_ref, v_ref, bias_ref, o_ref, *, scale):
    # One batch element per grid step, all heads packed: q/k/v blocks are (1, H, S, Dh).
    q = q_ref[0]                                   # (H, S, Dh)
    k = k_ref[0]
    v = v_ref[0]
    s = jnp.einsum('hqd,hkd->hqk', q, k, preferred_element_type=jnp.float32)
    s = s * scale + bias_ref[...]                  # bias block (1, 1, S) broadcasts
    m = jnp.max(s, axis=-1, keepdims=True)
    p = jnp.exp(s - m)
    p = p * pl.reciprocal(jnp.sum(p, axis=-1, keepdims=True), approx=True)
    o = jnp.einsum('hqk,hkd->hqd', p.astype(v.dtype), v,
                   preferred_element_type=jnp.float32)
    o_ref[0] = o.astype(o_ref.dtype)


# ----------------------------- kernel wrappers --------------------------------

def linear(x, w, b, *, apply_gelu=False):
    """y = x @ w + b (w stored (in, out)); row-tiled, N-tiled when large."""
    M, K = x.shape
    N = w.shape[1]
    tn = _col_tile(N)
    tm = _row_tile(M, K + tn, K * tn)
    xp = _pad_rows(x, tm)
    Mp = xp.shape[0]
    out = pl.pallas_call(
        functools.partial(_linear_kernel, apply_gelu=apply_gelu),
        out_shape=jax.ShapeDtypeStruct((Mp, N), x.dtype),
        grid_spec=pltpu.PrefetchScalarGridSpec(
            num_scalar_prefetch=0,
            grid=(Mp // tm, N // tn),
            in_specs=[pl.BlockSpec((tm, K), lambda i, j: (i, 0)),
                      pl.BlockSpec((K, tn), lambda i, j: (0, j)),
                      pl.BlockSpec((1, tn), lambda i, j: (0, j))],
            out_specs=pl.BlockSpec((tm, tn), lambda i, j: (i, j))),
        compiler_params=_compiler_params(2),
    )(xp, w, b.reshape(1, N))
    return out[:M]


def ln_linear(x, g, bln, w, b, *, apply_gelu=False, eps=_LN_EPS):
    """Fused LayerNorm(x) @ w + b (+ GELU)."""
    M, K = x.shape
    N = w.shape[1]
    tn = _col_tile(N)
    tm = _row_tile(M, K + tn, K * tn)
    xp = _pad_rows(x, tm)
    Mp = xp.shape[0]
    out = pl.pallas_call(
        functools.partial(_ln_linear_kernel, eps=eps, apply_gelu=apply_gelu),
        out_shape=jax.ShapeDtypeStruct((Mp, N), x.dtype),
        grid_spec=pltpu.PrefetchScalarGridSpec(
            num_scalar_prefetch=0,
            grid=(Mp // tm, N // tn),
            in_specs=[pl.BlockSpec((tm, K), lambda i, j: (i, 0)),
                      pl.BlockSpec((1, K), lambda i, j: (0, 0)),
                      pl.BlockSpec((1, K), lambda i, j: (0, 0)),
                      pl.BlockSpec((K, tn), lambda i, j: (0, j)),
                      pl.BlockSpec((1, tn), lambda i, j: (0, j))],
            out_specs=pl.BlockSpec((tm, tn), lambda i, j: (i, j))),
        compiler_params=_compiler_params(2),
    )(xp, g.reshape(1, K), bln.reshape(1, K), w, b.reshape(1, N))
    return out[:M]


def linear_residual(x, w, b, residual):
    """Fused x @ w + b + residual."""
    M, K = x.shape
    N = w.shape[1]
    tn = _col_tile(N)
    tm = _row_tile(M, K + 2 * tn, K * tn)
    xp = _pad_rows(x, tm)
    rp = _pad_rows(residual, tm)
    Mp = xp.shape[0]
    out = pl.pallas_call(
        _linear_residual_kernel,
        out_shape=jax.ShapeDtypeStruct((Mp, N), x.dtype),
        grid_spec=pltpu.PrefetchScalarGridSpec(
            num_scalar_prefetch=0,
            grid=(Mp // tm, N // tn),
            in_specs=[pl.BlockSpec((tm, K), lambda i, j: (i, 0)),
                      pl.BlockSpec((K, tn), lambda i, j: (0, j)),
                      pl.BlockSpec((1, tn), lambda i, j: (0, j)),
                      pl.BlockSpec((tm, tn), lambda i, j: (i, j))],
            out_specs=pl.BlockSpec((tm, tn), lambda i, j: (i, j))),
        compiler_params=_compiler_params(2),
    )(xp, w, b.reshape(1, N), rp)
    return out[:M]


def layernorm(x, gamma, beta, *, eps=_LN_EPS):
    M, D = x.shape
    tm = _row_tile(M, 2 * D)
    xp = _pad_rows(x, tm)
    Mp = xp.shape[0]
    out = pl.pallas_call(
        functools.partial(_layernorm_kernel, eps=eps),
        out_shape=jax.ShapeDtypeStruct((Mp, D), x.dtype),
        grid_spec=pltpu.PrefetchScalarGridSpec(
            num_scalar_prefetch=0,
            grid=(Mp // tm,),
            in_specs=[pl.BlockSpec((tm, D), lambda i: (i, 0)),
                      pl.BlockSpec((1, D), lambda i: (0, 0)),
                      pl.BlockSpec((1, D), lambda i: (0, 0))],
            out_specs=pl.BlockSpec((tm, D), lambda i: (i, 0))),
        compiler_params=_compiler_params(1),
    )(xp, gamma.reshape(1, D), beta.reshape(1, D))
    return out[:M]


def multihead_attention_core(q, k, v, bias3):
    """q,k,v: (B, H, S, Dh); bias3: (B, 1, S) additive key-padding bias."""
    B, H, S, Dh = q.shape
    scale = 1.0 / math.sqrt(Dh)
    qkv_spec = pl.BlockSpec((1, H, S, Dh), lambda b: (b, 0, 0, 0))
    return pl.pallas_call(
        functools.partial(_attention_kernel, scale=scale),
        out_shape=jax.ShapeDtypeStruct((B, H, S, Dh), q.dtype),
        grid_spec=pltpu.PrefetchScalarGridSpec(
            num_scalar_prefetch=0,
            grid=(B,),
            in_specs=[qkv_spec, qkv_spec, qkv_spec,
                      pl.BlockSpec((1, 1, S), lambda b: (b, 0, 0))],
            out_specs=pl.BlockSpec((1, H, S, Dh), lambda b: (b, 0, 0, 0))),
        compiler_params=_compiler_params(1),
    )(q, k, v, bias3)


# ----------------------------- model forward ----------------------------------

def encoder_layer(x, bias3, layer, num_heads):
    """Pre-norm TransformerEncoderLayer_QKV (self-attention branch, x_k=None)."""
    S, B, E = x.shape
    Dh = E // num_heads
    M = S * B
    x2d = x.reshape(M, E)

    # --- self-attention sublayer: fused LN0 + in_proj, attention, fused out_proj + residual
    qkv = ln_linear(x2d, layer['ln0_g'], layer['ln0_b'],
                    layer['in_proj_w'], layer['in_proj_b'])            # (M, 3E)
    qkv = qkv.reshape(S, B, 3, num_heads, Dh)
    q = qkv[:, :, 0].transpose(1, 2, 0, 3)                             # (B, H, S, Dh)
    k = qkv[:, :, 1].transpose(1, 2, 0, 3)
    v = qkv[:, :, 2].transpose(1, 2, 0, 3)
    attn = multihead_attention_core(q, k, v, bias3)                    # (B, H, S, Dh)
    attn = attn.transpose(2, 0, 1, 3).reshape(M, E)                    # (S,B,H,Dh)->(M,E)
    x2d = linear_residual(attn, layer['out_proj_w'], layer['out_proj_b'], x2d)

    # --- feed-forward sublayer: fused LN1 + fc1 + GELU, fused fc2 + residual
    h = ln_linear(x2d, layer['ln1_g'], layer['ln1_b'],
                  layer['fc1_w'], layer['fc1_b'], apply_gelu=True)
    x2d = linear_residual(h, layer['fc2_w'], layer['fc2_b'], x2d)
    return x2d.reshape(S, B, E)


def text_embedding_forward(params, text, text_len, *, num_heads):
    """text: (B, S) int32 token ids; text_len: (B,) int32. Returns (S, B, E)."""
    B, S = text.shape
    E = params['proj_w'].shape[1]

    # TODO(synk): fuse the embedding gather + proj_l via scalar-prefetch row gather;
    # kept as an XLA gather because a per-token pl.Element block would be step-overhead-bound.
    emb = jnp.take(params['embed_weight'], text, axis=0)               # (B, S, W)
    Wd = emb.shape[-1]

    # proj_l: Linear + GELU (+ Dropout==identity), then permute(1,0,2)
    x = linear(emb.reshape(B * S, Wd), params['proj_w'], params['proj_b'],
               apply_gelu=True)
    x = x.reshape(B, S, E).transpose(1, 0, 2)                          # (S, B, E)

    # learned 1D positional encoding (embed_scale = 1.0, dropout == identity)
    x = x + params['pos_embed'][:S][:, None, :]

    # key-padding additive bias, ONE row per batch (broadcast over heads in-kernel)
    key_pad = jnp.arange(S, dtype=jnp.int32)[None, :] >= text_len[:, None]
    bias3 = jnp.where(key_pad, jnp.float32(-1e9), jnp.float32(0.0))[:, None, :]  # (B,1,S)

    for layer in params['layers']:
        x = encoder_layer(x, bias3, layer, num_heads)

    out = layernorm(x.reshape(S * B, E), params['final_g'], params['final_b'])
    return out.reshape(S, B, E)


# ----------------------------- parameter init ---------------------------------

def _xavier(key, fan_in, fan_out):
    limit = math.sqrt(6.0 / (fan_in + fan_out))
    return jax.random.uniform(key, (fan_in, fan_out), jnp.float32, -limit, limit)


def init_params(key, *, vocab_size, wordvec_dim, embed_dim, num_layers, max_len):
    k_embed, k_proj, k_pos, k_layers = jax.random.split(key, 4)
    params = {
        'embed_weight': jax.random.normal(k_embed, (vocab_size, wordvec_dim),
                                          jnp.float32),
        'proj_w': _xavier(k_proj, wordvec_dim, embed_dim),
        'proj_b': jnp.zeros((embed_dim,), jnp.float32),
        'pos_embed': jax.random.uniform(k_pos, (max_len, embed_dim), jnp.float32),
        'final_g': jnp.ones((embed_dim,), jnp.float32),
        'final_b': jnp.zeros((embed_dim,), jnp.float32),
        'layers': [],
    }
    for lk in jax.random.split(k_layers, num_layers):
        k_in, k_out, k_fc1, k_fc2 = jax.random.split(lk, 4)
        params['layers'].append({
            'ln0_g': jnp.ones((embed_dim,), jnp.float32),
            'ln0_b': jnp.zeros((embed_dim,), jnp.float32),
            'ln1_g': jnp.ones((embed_dim,), jnp.float32),
            'ln1_b': jnp.zeros((embed_dim,), jnp.float32),
            # weights stored transposed vs torch: (in_features, out_features)
            'in_proj_w': _xavier(k_in, embed_dim, 3 * embed_dim),
            'in_proj_b': jnp.zeros((3 * embed_dim,), jnp.float32),
            'out_proj_w': _xavier(k_out, embed_dim, embed_dim),
            'out_proj_b': jnp.zeros((embed_dim,), jnp.float32),
            'fc1_w': _xavier(k_fc1, embed_dim, 4 * embed_dim),
            'fc1_b': jnp.zeros((4 * embed_dim,), jnp.float32),
            'fc2_w': _xavier(k_fc2, 4 * embed_dim, embed_dim),
            'fc2_b': jnp.zeros((embed_dim,), jnp.float32),
        })
    return params


# ----------------------------- pure-JAX reference ------------------------------

def _ref_linear(x, w, b, gelu=False):
    y = x @ w + b
    if gelu:
        y = 0.5 * y * (1.0 + jax.lax.erf(y / math.sqrt(2.0)))
    return y


def _ref_layernorm(x, g, b, eps=_LN_EPS):
    mean = x.mean(-1, keepdims=True)
    var = ((x - mean) ** 2).mean(-1, keepdims=True)
    return (x - mean) / jnp.sqrt(var + eps) * g + b


def ref_forward(params, text, text_len, *, num_heads):
    B, S = text.shape
    H = num_heads
    E = params['proj_w'].shape[1]
    Dh = E // H
    emb = params['embed_weight'][text]
    x = _ref_linear(emb, params['proj_w'], params['proj_b'], gelu=True)
    x = x.transpose(1, 0, 2) + params['pos_embed'][:S][:, None, :]
    key_pad = jnp.arange(S)[None, :] >= text_len[:, None]
    bias = jnp.where(key_pad, -1e9, 0.0)[:, None, None, :]            # (B,1,1,S)
    for layer in params['layers']:
        res = x
        xn = _ref_layernorm(x, layer['ln0_g'], layer['ln0_b'])
        qkv = _ref_linear(xn, layer['in_proj_w'], layer['in_proj_b'])
        q, k, v = jnp.split(qkv, 3, axis=-1)

        def heads(t):
            return t.reshape(S, B, H, Dh).transpose(1, 2, 0, 3)

        q, k, v = heads(q), heads(k), heads(v)
        s = jnp.einsum('bhqd,bhkd->bhqk', q, k) / math.sqrt(Dh) + bias
        p = jax.nn.softmax(s, axis=-1)
        o = jnp.einsum('bhqk,bhkd->bhqd', p, v).transpose(2, 0, 1, 3).reshape(S, B, E)
        o = _ref_linear(o, layer['out_proj_w'], layer['out_proj_b'])
        x = res + o
        res = x
        xn = _ref_layernorm(x, layer['ln1_g'], layer['ln1_b'])
        h = _ref_linear(xn, layer['fc1_w'], layer['fc1_b'], gelu=True)
        x = res + _ref_linear(h, layer['fc2_w'], layer['fc2_b'])
    return _ref_layernorm(x, params['final_g'], params['final_b'])


# --------------------------------- main -----------------------------------------

if __name__ == "__main__":
    B, S = 2, 8
    vocab_size, wordvec_dim, embed_dim = 100, 16, 32
    num_heads, num_layers, max_len = 4, 6, 128

    key = jax.random.PRNGKey(0)
    pkey, tkey = jax.random.split(key)
    params = init_params(pkey, vocab_size=vocab_size, wordvec_dim=wordvec_dim,
                         embed_dim=embed_dim, num_layers=num_layers, max_len=max_len)

    text = jax.random.randint(tkey, (B, S), 0, vocab_size, dtype=jnp.int32)
    text_len = jnp.array([8, 5], dtype=jnp.int32)

    fwd = jax.jit(functools.partial(text_embedding_forward, num_heads=num_heads))
    out = jax.block_until_ready(fwd(params, text, text_len))

    assert out.shape == (S, B, embed_dim), out.shape
    assert bool(jnp.all(jnp.isfinite(out)))

    ref = jax.block_until_ready(ref_forward(params, text, text_len, num_heads=num_heads))
    assert bool(jnp.allclose(out, ref, atol=5e-3, rtol=5e-3)), \
        float(jnp.max(jnp.abs(out - ref)))

    print("KERNEL_OK")
</pallas_src>

<mosaic_0001>
module attributes {stable_mosaic.version = 11 : i64} {
  func.func @_linear_kernel(%arg0: i32, %arg1: i32, %arg2: memref<16x16xf32, #tpu.memory_space<vmem>>, %arg3: memref<16x32xf32, #tpu.memory_space<vmem>>, %arg4: memref<1x32xf32, #tpu.memory_space<vmem>>, %arg5: memref<16x32xf32, #tpu.memory_space<vmem>>) attributes {dimension_semantics = [#tpu.dimension_semantics<parallel>, #tpu.dimension_semantics<parallel>], iteration_bounds = array<i64: 1, 1>, scalar_prefetch = 0 : i64, scratch_operands = 0 : i64, tpu.core_type = #tpu.core_type<tc>, window_params = [{transform_indices = @transform_0, window_bounds = array<i64: 16, 16>}, {transform_indices = @transform_1, window_bounds = array<i64: 16, 32>}, {transform_indices = @transform_2, window_bounds = array<i64: 1, 32>}, {transform_indices = @transform_3, window_bounds = array<i64: 16, 32>}]} {
    %c0 = arith.constant 0 : index
    %c0_0 = arith.constant 0 : index
    %0 = vector.load %arg2[%c0, %c0_0] : memref<16x16xf32, #tpu.memory_space<vmem>>, vector<16x16xf32>
    %c0_1 = arith.constant 0 : index
    %c0_2 = arith.constant 0 : index
    %1 = vector.load %arg3[%c0_1, %c0_2] : memref<16x32xf32, #tpu.memory_space<vmem>>, vector<16x32xf32>
    %cst = arith.constant dense<0.000000e+00> : vector<16x32xf32>
    %2 = tpu.matmul %0, %1, %cst {dimension_numbers = #tpu.dot_dimension_numbers<[1], [0], [0], [1], [0, 0, 1, 1], [], []>} : vector<16x16xf32>, vector<16x32xf32>, vector<16x32xf32> -> vector<16x32xf32>
    %c0_3 = arith.constant 0 : index
    %c0_4 = arith.constant 0 : index
    %3 = vector.load %arg4[%c0_3, %c0_4] : memref<1x32xf32, #tpu.memory_space<vmem>>, vector<1x32xf32>
    %4 = vector.broadcast %3 : vector<1x32xf32> to vector<16x32xf32>
    %5 = arith.addf %2, %4 : vector<16x32xf32>
    %cst_5 = arith.constant 5.000000e-01 : f32
    %6 = vector.broadcast %cst_5 : f32 to vector<16x32xf32>
    %7 = arith.mulf %6, %5 : vector<16x32xf32>
    %cst_6 = arith.constant 0.707106769 : f32
    %8 = vector.broadcast %cst_6 : f32 to vector<16x32xf32>
    %9 = arith.mulf %5, %8 : vector<16x32xf32>
    %10 = math.erf %9 : vector<16x32xf32>
    %cst_7 = arith.constant 1.000000e+00 : f32
    %11 = vector.broadcast %cst_7 : f32 to vector<16x32xf32>
    %12 = arith.addf %11, %10 : vector<16x32xf32>
    %13 = arith.mulf %7, %12 : vector<16x32xf32>
    %c0_8 = arith.constant 0 : index
    %c0_9 = arith.constant 0 : index
    %14 = vector.load %arg5[%c0_8, %c0_9] : memref<16x32xf32, #tpu.memory_space<vmem>>, vector<16x32xf32>
    tpu.vector_store %arg5[%c0_8, %c0_9], %13 {strides = array<i32>} : memref<16x32xf32, #tpu.memory_space<vmem>>, vector<16x32xf32>,
    return
  }
  func.func @transform_0(%arg0: i32, %arg1: i32) -> (i32, i32) {
    %c0_i32 = arith.constant 0 : i32
    %c0_i32_0 = arith.constant 0 : i32
    return %arg0, %c0_i32 : i32, i32
  }
  func.func @transform_1(%arg0: i32, %arg1: i32) -> (i32, i32) {
    %c0_i32 = arith.constant 0 : i32
    %c0_i32_0 = arith.constant 0 : i32
    return %c0_i32, %arg1 : i32, i32
  }
  func.func @transform_2(%arg0: i32, %arg1: i32) -> (i32, i32) {
    %c0_i32 = arith.constant 0 : i32
    %c0_i32_0 = arith.constant 0 : i32
    return %c0_i32, %arg1 : i32, i32
  }
  func.func @transform_3(%arg0: i32, %arg1: i32) -> (i32, i32) {
    %c0_i32 = arith.constant 0 : i32
    return %arg0, %arg1 : i32, i32
  }
}

module attributes {stable_mosaic.version = 11 : i64} {
  func.func @_ln_linear_kernel(%arg0: i32, %arg1: i32, %arg2: memref<16x32xf32, #tpu.memory_space<vmem>>, %arg3: memref<1x32xf32, #tpu.memory_space<vmem>>, %arg4: memref<1x32xf32, #tpu.memory_space<vmem>>, %arg5: memref<32x96xf32, #tpu.memory_space<vmem>>, %arg6: memref<1x96xf32, #tpu.memory_space<vmem>>, %arg7: memref<16x96xf32, #tpu.memory_space<vmem>>) attributes {dimension_semantics = [#tpu.dimension_semantics<parallel>, #tpu.dimension_semantics<parallel>], iteration_bounds = array<i64: 1, 1>, scalar_prefetch = 0 : i64, scratch_operands = 0 : i64, tpu.core_type = #tpu.core_type<tc>, window_params = [{transform_indices = @transform_0, window_bounds = array<i64: 16, 32>}, {pipeline_mode = #tpu.pipeline_mode<synchronous>, transform_indices = @transform_1, window_bounds = array<i64: 1, 32>}, {pipeline_mode = #tpu.pipeline_mode<synchronous>, transform_indices = @transform_2, window_bounds = array<i64: 1, 32>}, {transform_indices = @transform_3, window_bounds = array<i64: 32, 96>}, {transform_indices = @transform_4, window_bounds = array<i64: 1, 96>}, {transform_indices = @transform_5, window_bounds = array<i64: 16, 96>}]} {
    %c0 = arith.constant 0 : index
    %c0_0 = arith.constant 0 : index
    %0 = vector.load %arg2[%c0, %c0_0] : memref<16x32xf32, #tpu.memory_space<vmem>>, vector<16x32xf32>
    %cst = arith.constant dense<0.000000e+00> : vector<16xf32>
    %1 = vector.multi_reduction <add>, %0, %cst [1] : vector<16x32xf32> to vector<16xf32>
    %2 = vector.shape_cast %1 : vector<16xf32> to vector<16x1xf32>
    %cst_1 = arith.constant 3.200000e+01 : f32
    %3 = vector.broadcast %cst_1 : f32 to vector<16x1xf32>
    %4 = arith.divf %2, %3 : vector<16x1xf32>
    %5 = vector.broadcast %4 : vector<16x1xf32> to vector<16x32xf32>
    %6 = arith.subf %0, %5 : vector<16x32xf32>
    %7 = arith.mulf %6, %6 : vector<16x32xf32>
    %cst_2 = arith.constant dense<0.000000e+00> : vector<16xf32>
    %8 = vector.multi_reduction <add>, %7, %cst_2 [1] : vector<16x32xf32> to vector<16xf32>
    %9 = vector.shape_cast %8 : vector<16xf32> to vector<16x1xf32>
    %cst_3 = arith.constant 3.200000e+01 : f32
    %10 = vector.broadcast %cst_3 : f32 to vector<16x1xf32>
    %11 = arith.divf %9, %10 : vector<16x1xf32>
    %12 = vector.broadcast %4 : vector<16x1xf32> to vector<16x32xf32>
    %13 = arith.subf %0, %12 : vector<16x32xf32>
    %cst_4 = arith.constant 9.99999974E-6 : f32
    %14 = vector.broadcast %cst_4 : f32 to vector<16x1xf32>
    %15 = arith.addf %11, %14 : vector<16x1xf32>
    %16 = math.rsqrt %15 : vector<16x1xf32>
    %17 = vector.broadcast %16 : vector<16x1xf32> to vector<16x32xf32>
    %18 = arith.mulf %13, %17 : vector<16x32xf32>
    %c0_5 = arith.constant 0 : index
    %c0_6 = arith.constant 0 : index
    %19 = vector.load %arg3[%c0_5, %c0_6] : memref<1x32xf32, #tpu.memory_space<vmem>>, vector<1x32xf32>
    %20 = vector.broadcast %19 : vector<1x32xf32> to vector<16x32xf32>
    %21 = arith.mulf %18, %20 : vector<16x32xf32>
    %c0_7 = arith.constant 0 : index
    %c0_8 = arith.constant 0 : index
    %22 = vector.load %arg4[%c0_7, %c0_8] : memref<1x32xf32, #tpu.memory_space<vmem>>, vector<1x32xf32>
    %23 = vector.broadcast %22 : vector<1x32xf32> to vector<16x32xf32>
    %24 = arith.addf %21, %23 : vector<16x32xf32>
    %c0_9 = arith.constant 0 : index
    %c0_10 = arith.constant 0 : index
    %25 = vector.load %arg5[%c0_9, %c0_10] : memref<32x96xf32, #tpu.memory_space<vmem>>, vector<32x96xf32>
    %cst_11 = arith.constant dense<0.000000e+00> : vector<16x96xf32>
    %26 = tpu.matmul %24, %25, %cst_11 {dimension_numbers = #tpu.dot_dimension_numbers<[1], [0], [0], [1], [0, 0, 1, 1], [], []>} : vector<16x32xf32>, vector<32x96xf32>, vector<16x96xf32> -> vector<16x96xf32>
    %c0_12 = arith.constant 0 : index
    %c0_13 = arith.constant 0 : index
    %27 = vector.load %arg6[%c0_12, %c0_13] : memref<1x96xf32, #tpu.memory_space<vmem>>, vector<1x96xf32>
    %28 = vector.broadcast %27 : vector<1x96xf32> to vector<16x96xf32>
    %29 = arith.addf %26, %28 : vector<16x96xf32>
    %c0_14 = arith.constant 0 : index
    %c0_15 = arith.constant 0 : index
    %30 = vector.load %arg7[%c0_14, %c0_15] : memref<16x96xf32, #tpu.memory_space<vmem>>, vector<16x96xf32>
    tpu.vector_store %arg7[%c0_14, %c0_15], %29 {strides = array<i32>} : memref<16x96xf32, #tpu.memory_space<vmem>>, vector<16x96xf32>,
    return
  }
  func.func @transform_0(%arg0: i32, %arg1: i32) -> (i32, i32) {
    %c0_i32 = arith.constant 0 : i32
    %c0_i32_0 = arith.constant 0 : i32
    return %arg0, %c0_i32 : i32, i32
  }
  func.func @transform_1(%arg0: i32, %arg1: i32) -> (i32, i32) {
    %c0_i32 = arith.constant 0 : i32
    %c0_i32_0 = arith.constant 0 : i32
    %c0_i32_1 = arith.constant 0 : i32
    return %c0_i32, %c0_i32_0 : i32, i32
  }
  func.func @transform_2(%arg0: i32, %arg1: i32) -> (i32, i32) {
    %c0_i32 = arith.constant 0 : i32
    %c0_i32_0 = arith.constant 0 : i32
    %c0_i32_1 = arith.constant 0 : i32
    return %c0_i32, %c0_i32_0 : i32, i32
  }
  func.func @transform_3(%arg0: i32, %arg1: i32) -> (i32, i32) {
    %c0_i32 = arith.constant 0 : i32
    %c0_i32_0 = arith.constant 0 : i32
    return %c0_i32, %arg1 : i32, i32
  }
  func.func @transform_4(%arg0: i32, %arg1: i32) -> (i32, i32) {
    %c0_i32 = arith.constant 0 : i32
    %c0_i32_0 = arith.constant 0 : i32
    return %c0_i32, %arg1 : i32, i32
  }
  func.func @transform_5(%arg0: i32, %arg1: i32) -> (i32, i32) {
    %c0_i32 = arith.constant 0 : i32
    return %arg0, %arg1 : i32, i32
  }
}

module attributes {stable_mosaic.version = 11 : i64} {
  func.func @_attention_kernel(%arg0: i32, %arg1: memref<1x4x8x8xf32, #tpu.memory_space<vmem>>, %arg2: memref<1x4x8x8xf32, #tpu.memory_space<vmem>>, %arg3: memref<1x4x8x8xf32, #tpu.memory_space<vmem>>, %arg4: memref<1x1x8xf32, #tpu.memory_space<vmem>>, %arg5: memref<1x4x8x8xf32, #tpu.memory_space<vmem>>) attributes {dimension_semantics = [#tpu.dimension_semantics<parallel>], iteration_bounds = array<i64: 2>, scalar_prefetch = 0 : i64, scratch_operands = 0 : i64, tpu.core_type = #tpu.core_type<tc>, window_params = [{transform_indices = @transform_0, window_bounds = array<i64: 1, 4, 8, 8>}, {transform_indices = @transform_1, window_bounds = array<i64: 1, 4, 8, 8>}, {transform_indices = @transform_2, window_bounds = array<i64: 1, 4, 8, 8>}, {transform_indices = @transform_3, window_bounds = array<i64: 1, 1, 8>}, {transform_indices = @transform_4, window_bounds = array<i64: 1, 4, 8, 8>}]} {
    %c0 = arith.constant 0 : index
    %c0_0 = arith.constant 0 : index
    %c0_1 = arith.constant 0 : index
    %c0_2 = arith.constant 0 : index
    %0 = vector.load %arg1[%c0, %c0_0, %c0_1, %c0_2] : memref<1x4x8x8xf32, #tpu.memory_space<vmem>>, vector<1x4x8x8xf32>
    %1 = vector.shape_cast %0 : vector<1x4x8x8xf32> to vector<4x8x8xf32>
    %c0_3 = arith.constant 0 : index
    %c0_4 = arith.constant 0 : index
    %c0_5 = arith.constant 0 : index
    %c0_6 = arith.constant 0 : index
    %2 = vector.load %arg2[%c0_3, %c0_4, %c0_5, %c0_6] : memref<1x4x8x8xf32, #tpu.memory_space<vmem>>, vector<1x4x8x8xf32>
    %3 = vector.shape_cast %2 : vector<1x4x8x8xf32> to vector<4x8x8xf32>
    %c0_7 = arith.constant 0 : index
    %c0_8 = arith.constant 0 : index
    %c0_9 = arith.constant 0 : index
    %c0_10 = arith.constant 0 : index
    %4 = vector.load %arg3[%c0_7, %c0_8, %c0_9, %c0_10] : memref<1x4x8x8xf32, #tpu.memory_space<vmem>>, vector<1x4x8x8xf32>
    %5 = vector.shape_cast %4 : vector<1x4x8x8xf32> to vector<4x8x8xf32>
    "tpu.trace_start"() <{level = 10 : i32, message = "hqd,hkd->hqk"}> : () -> ()
    %cst = arith.constant dense<0.000000e+00> : vector<4x8x8xf32>
    %6 = tpu.matmul %1, %3, %cst {dimension_numbers = #tpu.dot_dimension_numbers<[2], [2], [1], [1], [0, 0, 0, 1, 1, 1], [0], [0]>} : vector<4x8x8xf32>, vector<4x8x8xf32>, vector<4x8x8xf32> -> vector<4x8x8xf32>
    "tpu.trace_stop"() : () -> ()
    %cst_11 = arith.constant 0.353553385 : f32
    %7 = vector.broadcast %cst_11 : f32 to vector<4x8x8xf32>
    %8 = arith.mulf %6, %7 : vector<4x8x8xf32>
    %c0_12 = arith.constant 0 : index
    %c0_13 = arith.constant 0 : index
    %c0_14 = arith.constant 0 : index
    %9 = vector.load %arg4[%c0_12, %c0_13, %c0_14] : memref<1x1x8xf32, #tpu.memory_space<vmem>>, vector<1x1x8xf32>
    %10 = vector.broadcast %9 : vector<1x1x8xf32> to vector<4x8x8xf32>
    %11 = arith.addf %8, %10 : vector<4x8x8xf32>
    %cst_15 = arith.constant dense<0xFF800000> : vector<4x8xf32>
    %12 = vector.multi_reduction <maximumf>, %11, %cst_15 [2] : vector<4x8x8xf32> to vector<4x8xf32>
    %13 = vector.shape_cast %12 : vector<4x8xf32> to vector<4x8x1xf32>
    %14 = vector.broadcast %13 : vector<4x8x1xf32> to vector<4x8x8xf32>
    %15 = arith.subf %11, %14 : vector<4x8x8xf32>
    %16 = math.exp %15 : vector<4x8x8xf32>
    %cst_16 = arith.constant dense<0.000000e+00> : vector<4x8xf32>
    %17 = vector.multi_reduction <add>, %16, %cst_16 [2] : vector<4x8x8xf32> to vector<4x8xf32>
    %18 = vector.shape_cast %17 : vector<4x8xf32> to vector<4x8x1xf32>
    %19 = tpu.reciprocal %18 {approx = true} : vector<4x8x1xf32> -> vector<4x8x1xf32>
    %20 = vector.broadcast %19 : vector<4x8x1xf32> to vector<4x8x8xf32>
    %21 = arith.mulf %16, %20 : vector<4x8x8xf32>
    "tpu.trace_start"() <{level = 10 : i32, message = "hqk,hkd->hqd"}> : () -> ()
    %cst_17 = arith.constant dense<0.000000e+00> : vector<4x8x8xf32>
    %22 = tpu.matmul %21, %5, %cst_17 {dimension_numbers = #tpu.dot_dimension_numbers<[2], [1], [1], [2], [0, 0, 0, 1, 1, 2], [0], [0]>} : vector<4x8x8xf32>, vector<4x8x8xf32>, vector<4x8x8xf32> -> vector<4x8x8xf32>
    "tpu.trace_stop"() : () -> ()
    %c0_18 = arith.constant 0 : index
    %c0_19 = arith.constant 0 : index
    %c0_20 = arith.constant 0 : index
    %c0_21 = arith.constant 0 : index
    %23 = vector.load %arg5[%c0_18, %c0_19, %c0_20, %c0_21] : memref<1x4x8x8xf32, #tpu.memory_space<vmem>>, vector<1x4x8x8xf32>
    %24 = vector.shape_cast %23 : vector<1x4x8x8xf32> to vector<4x8x8xf32>
    %25 = vector.shape_cast %22 : vector<4x8x8xf32> to vector<1x4x8x8xf32>
    tpu.vector_store %arg5[%c0_18, %c0_19, %c0_20, %c0_21], %25 {strides = array<i32>} : memref<1x4x8x8xf32, #tpu.memory_space<vmem>>, vector<1x4x8x8xf32>,
    return
  }
  func.func @transform_0(%arg0: i32) -> (i32, i32, i32, i32) {
    %c0_i32 = arith.constant 0 : i32
    %c0_i32_0 = arith.constant 0 : i32
    %c0_i32_1 = arith.constant 0 : i32
    %c0_i32_2 = arith.constant 0 : i32
    return %arg0, %c0_i32, %c0_i32_0, %c0_i32_1 : i32, i32, i32, i32
  }
  func.func @transform_1(%arg0: i32) -> (i32, i32, i32, i32) {
    %c0_i32 = arith.constant 0 : i32
    %c0_i32_0 = arith.constant 0 : i32
    %c0_i32_1 = arith.constant 0 : i32
    %c0_i32_2 = arith.constant 0 : i32
    return %arg0, %c0_i32, %c0_i32_0, %c0_i32_1 : i32, i32, i32, i32
  }
  func.func @transform_2(%arg0: i32) -> (i32, i32, i32, i32) {
    %c0_i32 = arith.constant 0 : i32
    %c0_i32_0 = arith.constant 0 : i32
    %c0_i32_1 = arith.constant 0 : i32
    %c0_i32_2 = arith.constant 0 : i32
    return %arg0, %c0_i32, %c0_i32_0, %c0_i32_1 : i32, i32, i32, i32
  }
  func.func @transform_3(%arg0: i32) -> (i32, i32, i32) {
    %c0_i32 = arith.constant 0 : i32
    %c0_i32_0 = arith.constant 0 : i32
    %c0_i32_1 = arith.constant 0 : i32
    return %arg0, %c0_i32, %c0_i32_0 : i32, i32, i32
  }
  func.func @transform_4(%arg0: i32) -> (i32, i32, i32, i32) {
    %c0_i32 = arith.constant 0 : i32
    %c0_i32_0 = arith.constant 0 : i32
    %c0_i32_1 = arith.constant 0 : i32
    %c0_i32_2 = arith.constant 0 : i32
    return %arg0, %c0_i32, %c0_i32_0, %c0_i32_1 : i32, i32, i32, i32
  }
}

module attributes {stable_mosaic.version = 11 : i64} {
  func.func @_linear_residual_kernel(%arg0: i32, %arg1: i32, %arg2: memref<16x32xf32, #tpu.memory_space<vmem>>, %arg3: memref<32x32xf32, #tpu.memory_space<vmem>>, %arg4: memref<1x32xf32, #tpu.memory_space<vmem>>, %arg5: memref<16x32xf32, #tpu.memory_space<vmem>>, %arg6: memref<16x32xf32, #tpu.memory_space<vmem>>) attributes {dimension_semantics = [#tpu.dimension_semantics<parallel>, #tpu.dimension_semantics<parallel>], iteration_bounds = array<i64: 1, 1>, scalar_prefetch = 0 : i64, scratch_operands = 0 : i64, tpu.core_type = #tpu.core_type<tc>, window_params = [{transform_indices = @transform_0, window_bounds = array<i64: 16, 32>}, {transform_indices = @transform_1, window_bounds = array<i64: 32, 32>}, {transform_indices = @transform_2, window_bounds = array<i64: 1, 32>}, {transform_indices = @transform_3, window_bounds = array<i64: 16, 32>}, {transform_indices = @transform_4, window_bounds = array<i64: 16, 32>}]} {
    %c0 = arith.constant 0 : index
    %c0_0 = arith.constant 0 : index
    %0 = vector.load %arg2[%c0, %c0_0] : memref<16x32xf32, #tpu.memory_space<vmem>>, vector<16x32xf32>
    %c0_1 = arith.constant 0 : index
    %c0_2 = arith.constant 0 : index
    %1 = vector.load %arg3[%c0_1, %c0_2] : memref<32x32xf32, #tpu.memory_space<vmem>>, vector<32x32xf32>
    %cst = arith.constant dense<0.000000e+00> : vector<16x32xf32>
    %2 = tpu.matmul %0, %1, %cst {dimension_numbers = #tpu.dot_dimension_numbers<[1], [0], [0], [1], [0, 0, 1, 1], [], []>} : vector<16x32xf32>, vector<32x32xf32>, vector<16x32xf32> -> vector<16x32xf32>
    %c0_3 = arith.constant 0 : index
    %c0_4 = arith.constant 0 : index
    %3 = vector.load %arg4[%c0_3, %c0_4] : memref<1x32xf32, #tpu.memory_space<vmem>>, vector<1x32xf32>
    %4 = vector.broadcast %3 : vector<1x32xf32> to vector<16x32xf32>
    %5 = arith.addf %2, %4 : vector<16x32xf32>
    %c0_5 = arith.constant 0 : index
    %c0_6 = arith.constant 0 : index
    %6 = vector.load %arg5[%c0_5, %c0_6] : memref<16x32xf32, #tpu.memory_space<vmem>>, vector<16x32xf32>
    %7 = arith.addf %5, %6 : vector<16x32xf32>
    %c0_7 = arith.constant 0 : index
    %c0_8 = arith.constant 0 : index
    %8 = vector.load %arg6[%c0_7, %c0_8] : memref<16x32xf32, #tpu.memory_space<vmem>>, vector<16x32xf32>
    tpu.vector_store %arg6[%c0_7, %c0_8], %7 {strides = array<i32>} : memref<16x32xf32, #tpu.memory_space<vmem>>, vector<16x32xf32>,
    return
  }
  func.func @transform_0(%arg0: i32, %arg1: i32) -> (i32, i32) {
    %c0_i32 = arith.constant 0 : i32
    %c0_i32_0 = arith.constant 0 : i32
    return %arg0, %c0_i32 : i32, i32
  }
  func.func @transform_1(%arg0: i32, %arg1: i32) -> (i32, i32) {
    %c0_i32 = arith.constant 0 : i32
    %c0_i32_0 = arith.constant 0 : i32
    return %c0_i32, %arg1 : i32, i32
  }
  func.func @transform_2(%arg0: i32, %arg1: i32) -> (i32, i32) {
    %c0_i32 = arith.constant 0 : i32
    %c0_i32_0 = arith.constant 0 : i32
    return %c0_i32, %arg1 : i32, i32
  }
  func.func @transform_3(%arg0: i32, %arg1: i32) -> (i32, i32) {
    %c0_i32 = arith.constant 0 : i32
    return %arg0, %arg1 : i32, i32
  }
  func.func @transform_4(%arg0: i32, %arg1: i32) -> (i32, i32) {
    %c0_i32 = arith.constant 0 : i32
    return %arg0, %arg1 : i32, i32
  }
}

module attributes {stable_mosaic.version = 11 : i64} {
  func.func @_linear_residual_kernel(%arg0: i32, %arg1: i32, %arg2: memref<16x128xf32, #tpu.memory_space<vmem>>, %arg3: memref<128x32xf32, #tpu.memory_space<vmem>>, %arg4: memref<1x32xf32, #tpu.memory_space<vmem>>, %arg5: memref<16x32xf32, #tpu.memory_space<vmem>>, %arg6: memref<16x32xf32, #tpu.memory_space<vmem>>) attributes {dimension_semantics = [#tpu.dimension_semantics<parallel>, #tpu.dimension_semantics<parallel>], iteration_bounds = array<i64: 1, 1>, scalar_prefetch = 0 : i64, scratch_operands = 0 : i64, tpu.core_type = #tpu.core_type<tc>, window_params = [{transform_indices = @transform_0, window_bounds = array<i64: 16, 128>}, {transform_indices = @transform_1, window_bounds = array<i64: 128, 32>}, {transform_indices = @transform_2, window_bounds = array<i64: 1, 32>}, {transform_indices = @transform_3, window_bounds = array<i64: 16, 32>}, {transform_indices = @transform_4, window_bounds = array<i64: 16, 32>}]} {
    %c0 = arith.constant 0 : index
    %c0_0 = arith.constant 0 : index
    %0 = vector.load %arg2[%c0, %c0_0] : memref<16x128xf32, #tpu.memory_space<vmem>>, vector<16x128xf32>
    %c0_1 = arith.constant 0 : index
    %c0_2 = arith.constant 0 : index
    %1 = vector.load %arg3[%c0_1, %c0_2] : memref<128x32xf32, #tpu.memory_space<vmem>>, vector<128x32xf32>
    %cst = arith.constant dense<0.000000e+00> : vector<16x32xf32>
    %2 = tpu.matmul %0, %1, %cst {dimension_numbers = #tpu.dot_dimension_numbers<[1], [0], [0], [1], [0, 0, 1, 1], [], []>} : vector<16x128xf32>, vector<128x32xf32>, vector<16x32xf32> -> vector<16x32xf32>
    %c0_3 = arith.constant 0 : index
    %c0_4 = arith.constant 0 : index
    %3 = vector.load %arg4[%c0_3, %c0_4] : memref<1x32xf32, #tpu.memory_space<vmem>>, vector<1x32xf32>
    %4 = vector.broadcast %3 : vector<1x32xf32> to vector<16x32xf32>
    %5 = arith.addf %2, %4 : vector<16x32xf32>
    %c0_5 = arith.constant 0 : index
    %c0_6 = arith.constant 0 : index
    %6 = vector.load %arg5[%c0_5, %c0_6] : memref<16x32xf32, #tpu.memory_space<vmem>>, vector<16x32xf32>
    %7 = arith.addf %5, %6 : vector<16x32xf32>
    %c0_7 = arith.constant 0 : index
    %c0_8 = arith.constant 0 : index
    %8 = vector.load %arg6[%c0_7, %c0_8] : memref<16x32xf32, #tpu.memory_space<vmem>>, vector<16x32xf32>
    tpu.vector_store %arg6[%c0_7, %c0_8], %7 {strides = array<i32>} : memref<16x32xf32, #tpu.memory_space<vmem>>, vector<16x32xf32>,
    return
  }
  func.func @transform_0(%arg0: i32, %arg1: i32) -> (i32, i32) {
    %c0_i32 = arith.constant 0 : i32
    %c0_i32_0 = arith.constant 0 : i32
    return %arg0, %c0_i32 : i32, i32
  }
  func.func @transform_1(%arg0: i32, %arg1: i32) -> (i32, i32) {
    %c0_i32 = arith.constant 0 : i32
    %c0_i32_0 = arith.constant 0 : i32
    return %c0_i32, %arg1 : i32, i32
  }
  func.func @transform_2(%arg0: i32, %arg1: i32) -> (i32, i32) {
    %c0_i32 = arith.constant 0 : i32
    %c0_i32_0 = arith.constant 0 : i32
    return %c0_i32, %arg1 : i32, i32
  }
  func.func @transform_3(%arg0: i32, %arg1: i32) -> (i32, i32) {
    %c0_i32 = arith.constant 0 : i32
    return %arg0, %arg1 : i32, i32
  }
  func.func @transform_4(%arg0: i32, %arg1: i32) -> (i32, i32) {
    %c0_i32 = arith.constant 0 : i32
    return %arg0, %arg1 : i32, i32
  }
}

module attributes {stable_mosaic.version = 11 : i64} {
  func.func @_layernorm_kernel(%arg0: i32, %arg1: memref<16x32xf32, #tpu.memory_space<vmem>>, %arg2: memref<1x32xf32, #tpu.memory_space<vmem>>, %arg3: memref<1x32xf32, #tpu.memory_space<vmem>>, %arg4: memref<16x32xf32, #tpu.memory_space<vmem>>) attributes {dimension_semantics = [#tpu.dimension_semantics<parallel>], iteration_bounds = array<i64: 1>, scalar_prefetch = 0 : i64, scratch_operands = 0 : i64, tpu.core_type = #tpu.core_type<tc>, window_params = [{transform_indices = @transform_0, window_bounds = array<i64: 16, 32>}, {pipeline_mode = #tpu.pipeline_mode<synchronous>, transform_indices = @transform_1, window_bounds = array<i64: 1, 32>}, {pipeline_mode = #tpu.pipeline_mode<synchronous>, transform_indices = @transform_2, window_bounds = array<i64: 1, 32>}, {transform_indices = @transform_3, window_bounds = array<i64: 16, 32>}]} {
    %c0 = arith.constant 0 : index
    %c0_0 = arith.constant 0 : index
    %0 = vector.load %arg1[%c0, %c0_0] : memref<16x32xf32, #tpu.memory_space<vmem>>, vector<16x32xf32>
    %cst = arith.constant dense<0.000000e+00> : vector<16xf32>
    %1 = vector.multi_reduction <add>, %0, %cst [1] : vector<16x32xf32> to vector<16xf32>
    %2 = vector.shape_cast %1 : vector<16xf32> to vector<16x1xf32>
    %cst_1 = arith.constant 3.200000e+01 : f32
    %3 = vector.broadcast %cst_1 : f32 to vector<16x1xf32>
    %4 = arith.divf %2, %3 : vector<16x1xf32>
    %5 = vector.broadcast %4 : vector<16x1xf32> to vector<16x32xf32>
    %6 = arith.subf %0, %5 : vector<16x32xf32>
    %7 = arith.mulf %6, %6 : vector<16x32xf32>
    %cst_2 = arith.constant dense<0.000000e+00> : vector<16xf32>
    %8 = vector.multi_reduction <add>, %7, %cst_2 [1] : vector<16x32xf32> to vector<16xf32>
    %9 = vector.shape_cast %8 : vector<16xf32> to vector<16x1xf32>
    %cst_3 = arith.constant 3.200000e+01 : f32
    %10 = vector.broadcast %cst_3 : f32 to vector<16x1xf32>
    %11 = arith.divf %9, %10 : vector<16x1xf32>
    %12 = vector.broadcast %4 : vector<16x1xf32> to vector<16x32xf32>
    %13 = arith.subf %0, %12 : vector<16x32xf32>
    %cst_4 = arith.constant 9.99999974E-6 : f32
    %14 = vector.broadcast %cst_4 : f32 to vector<16x1xf32>
    %15 = arith.addf %11, %14 : vector<16x1xf32>
    %16 = math.rsqrt %15 : vector<16x1xf32>
    %17 = vector.broadcast %16 : vector<16x1xf32> to vector<16x32xf32>
    %18 = arith.mulf %13, %17 : vector<16x32xf32>
    %c0_5 = arith.constant 0 : index
    %c0_6 = arith.constant 0 : index
    %19 = vector.load %arg2[%c0_5, %c0_6] : memref<1x32xf32, #tpu.memory_space<vmem>>, vector<1x32xf32>
    %20 = vector.broadcast %19 : vector<1x32xf32> to vector<16x32xf32>
    %21 = arith.mulf %18, %20 : vector<16x32xf32>
    %c0_7 = arith.constant 0 : index
    %c0_8 = arith.constant 0 : index
    %22 = vector.load %arg3[%c0_7, %c0_8] : memref<1x32xf32, #tpu.memory_space<vmem>>, vector<1x32xf32>
    %23 = vector.broadcast %22 : vector<1x32xf32> to vector<16x32xf32>
    %24 = arith.addf %21, %23 : vector<16x32xf32>
    %c0_9 = arith.constant 0 : index
    %c0_10 = arith.constant 0 : index
    %25 = vector.load %arg4[%c0_9, %c0_10] : memref<16x32xf32, #tpu.memory_space<vmem>>, vector<16x32xf32>
    tpu.vector_store %arg4[%c0_9, %c0_10], %24 {strides = array<i32>} : memref<16x32xf32, #tpu.memory_space<vmem>>, vector<16x32xf32>,
    return
  }
  func.func @transform_0(%arg0: i32) -> (i32, i32) {
    %c0_i32 = arith.constant 0 : i32
    %c0_i32_0 = arith.constant 0 : i32
    return %arg0, %c0_i32 : i32, i32
  }
  func.func @transform_1(%arg0: i32) -> (i32, i32) {
    %c0_i32 = arith.constant 0 : i32
    %c0_i32_0 = arith.constant 0 : i32
    %c0_i32_1 = arith.constant 0 : i32
    return %c0_i32, %c0_i32_0 : i32, i32
  }
  func.func @transform_2(%arg0: i32) -> (i32, i32) {
    %c0_i32 = arith.constant 0 : i32
    %c0_i32_0 = arith.constant 0 : i32
    %c0_i32_1 = arith.constant 0 : i32
    return %c0_i32, %c0_i32_0 : i32, i32
  }
  func.func @transform_3(%arg0: i32) -> (i32, i32) {
    %c0_i32 = arith.constant 0 : i32
    %c0_i32_0 = arith.constant 0 : i32
    return %arg0, %c0_i32 : i32, i32
  }
}

module attributes {stable_mosaic.version = 11 : i64} {
  func.func @_ln_linear_kernel(%arg0: i32, %arg1: i32, %arg2: memref<16x32xf32, #tpu.memory_space<vmem>>, %arg3: memref<1x32xf32, #tpu.memory_space<vmem>>, %arg4: memref<1x32xf32, #tpu.memory_space<vmem>>, %arg5: memref<32x128xf32, #tpu.memory_space<vmem>>, %arg6: memref<1x128xf32, #tpu.memory_space<vmem>>, %arg7: memref<16x128xf32, #tpu.memory_space<vmem>>) attributes {dimension_semantics = [#tpu.dimension_semantics<parallel>, #tpu.dimension_semantics<parallel>], iteration_bounds = array<i64: 1, 1>, scalar_prefetch = 0 : i64, scratch_operands = 0 : i64, tpu.core_type = #tpu.core_type<tc>, window_params = [{transform_indices = @transform_0, window_bounds = array<i64: 16, 32>}, {pipeline_mode = #tpu.pipeline_mode<synchronous>, transform_indices = @transform_1, window_bounds = array<i64: 1, 32>}, {pipeline_mode = #tpu.pipeline_mode<synchronous>, transform_indices = @transform_2, window_bounds = array<i64: 1, 32>}, {transform_indices = @transform_3, window_bounds = array<i64: 32, 128>}, {transform_indices = @transform_4, window_bounds = array<i64: 1, 128>}, {transform_indices = @transform_5, window_bounds = array<i64: 16, 128>}]} {
    %c0 = arith.constant 0 : index
    %c0_0 = arith.constant 0 : index
    %0 = vector.load %arg2[%c0, %c0_0] : memref<16x32xf32, #tpu.memory_space<vmem>>, vector<16x32xf32>
    %cst = arith.constant dense<0.000000e+00> : vector<16xf32>
    %1 = vector.multi_reduction <add>, %0, %cst [1] : vector<16x32xf32> to vector<16xf32>
    %2 = vector.shape_cast %1 : vector<16xf32> to vector<16x1xf32>
    %cst_1 = arith.constant 3.200000e+01 : f32
    %3 = vector.broadcast %cst_1 : f32 to vector<16x1xf32>
    %4 = arith.divf %2, %3 : vector<16x1xf32>
    %5 = vector.broadcast %4 : vector<16x1xf32> to vector<16x32xf32>
    %6 = arith.subf %0, %5 : vector<16x32xf32>
    %7 = arith.mulf %6, %6 : vector<16x32xf32>
    %cst_2 = arith.constant dense<0.000000e+00> : vector<16xf32>
    %8 = vector.multi_reduction <add>, %7, %cst_2 [1] : vector<16x32xf32> to vector<16xf32>
    %9 = vector.shape_cast %8 : vector<16xf32> to vector<16x1xf32>
    %cst_3 = arith.constant 3.200000e+01 : f32
    %10 = vector.broadcast %cst_3 : f32 to vector<16x1xf32>
    %11 = arith.divf %9, %10 : vector<16x1xf32>
    %12 = vector.broadcast %4 : vector<16x1xf32> to vector<16x32xf32>
    %13 = arith.subf %0, %12 : vector<16x32xf32>
    %cst_4 = arith.constant 9.99999974E-6 : f32
    %14 = vector.broadcast %cst_4 : f32 to vector<16x1xf32>
    %15 = arith.addf %11, %14 : vector<16x1xf32>
    %16 = math.rsqrt %15 : vector<16x1xf32>
    %17 = vector.broadcast %16 : vector<16x1xf32> to vector<16x32xf32>
    %18 = arith.mulf %13, %17 : vector<16x32xf32>
    %c0_5 = arith.constant 0 : index
    %c0_6 = arith.constant 0 : index
    %19 = vector.load %arg3[%c0_5, %c0_6] : memref<1x32xf32, #tpu.memory_space<vmem>>, vector<1x32xf32>
    %20 = vector.broadcast %19 : vector<1x32xf32> to vector<16x32xf32>
    %21 = arith.mulf %18, %20 : vector<16x32xf32>
    %c0_7 = arith.constant 0 : index
    %c0_8 = arith.constant 0 : index
    %22 = vector.load %arg4[%c0_7, %c0_8] : memref<1x32xf32, #tpu.memory_space<vmem>>, vector<1x32xf32>
    %23 = vector.broadcast %22 : vector<1x32xf32> to vector<16x32xf32>
    %24 = arith.addf %21, %23 : vector<16x32xf32>
    %c0_9 = arith.constant 0 : index
    %c0_10 = arith.constant 0 : index
    %25 = vector.load %arg5[%c0_9, %c0_10] : memref<32x128xf32, #tpu.memory_space<vmem>>, vector<32x128xf32>
    %cst_11 = arith.constant dense<0.000000e+00> : vector<16x128xf32>
    %26 = tpu.matmul %24, %25, %cst_11 {dimension_numbers = #tpu.dot_dimension_numbers<[1], [0], [0], [1], [0, 0, 1, 1], [], []>} : vector<16x32xf32>, vector<32x128xf32>, vector<16x128xf32> -> vector<16x128xf32>
    %c0_12 = arith.constant 0 : index
    %c0_13 = arith.constant 0 : index
    %27 = vector.load %arg6[%c0_12, %c0_13] : memref<1x128xf32, #tpu.memory_space<vmem>>, vector<1x128xf32>
    %28 = vector.broadcast %27 : vector<1x128xf32> to vector<16x128xf32>
    %29 = arith.addf %26, %28 : vector<16x128xf32>
    %cst_14 = arith.constant 5.000000e-01 : f32
    %30 = vector.broadcast %cst_14 : f32 to vector<16x128xf32>
    %31 = arith.mulf %30, %29 : vector<16x128xf32>
    %cst_15 = arith.constant 0.707106769 : f32
    %32 = vector.broadcast %cst_15 : f32 to vector<16x128xf32>
    %33 = arith.mulf %29, %32 : vector<16x128xf32>
    %34 = math.erf %33 : vector<16x128xf32>
    %cst_16 = arith.constant 1.000000e+00 : f32
    %35 = vector.broadcast %cst_16 : f32 to vector<16x128xf32>
    %36 = arith.addf %35, %34 : vector<16x128xf32>
    %37 = arith.mulf %31, %36 : vector<16x128xf32>
    %c0_17 = arith.constant 0 : index
    %c0_18 = arith.constant 0 : index
    %38 = vector.load %arg7[%c0_17, %c0_18] : memref<16x128xf32, #tpu.memory_space<vmem>>, vector<16x128xf32>
    tpu.vector_store %arg7[%c0_17, %c0_18], %37 {strides = array<i32>} : memref<16x128xf32, #tpu.memory_space<vmem>>, vector<16x128xf32>,
    return
  }
  func.func @transform_0(%arg0: i32, %arg1: i32) -> (i32, i32) {
    %c0_i32 = arith.constant 0 : i32
    %c0_i32_0 = arith.constant 0 : i32
    return %arg0, %c0_i32 : i32, i32
  }
  func.func @transform_1(%arg0: i32, %arg1: i32) -> (i32, i32) {
    %c0_i32 = arith.constant 0 : i32
    %c0_i32_0 = arith.constant 0 : i32
    %c0_i32_1 = arith.constant 0 : i32
    return %c0_i32, %c0_i32_0 : i32, i32
  }
  func.func @transform_2(%arg0: i32, %arg1: i32) -> (i32, i32) {
    %c0_i32 = arith.constant 0 : i32
    %c0_i32_0 = arith.constant 0 : i32
    %c0_i32_1 = arith.constant 0 : i32
    return %c0_i32, %c0_i32_0 : i32, i32
  }
  func.func @transform_3(%arg0: i32, %arg1: i32) -> (i32, i32) {
    %c0_i32 = arith.constant 0 : i32
    %c0_i32_0 = arith.constant 0 : i32
    return %c0_i32, %arg1 : i32, i32
  }
  func.func @transform_4(%arg0: i32, %arg1: i32) -> (i32, i32) {
    %c0_i32 = arith.constant 0 : i32
    %c0_i32_0 = arith.constant 0 : i32
    return %c0_i32, %arg1 : i32, i32
  }
  func.func @transform_5(%arg0: i32, %arg1: i32) -> (i32, i32) {
    %c0_i32 = arith.constant 0 : i32
    return %arg0, %arg1 : i32, i32
  }
}

</mosaic_0001>

<bundles_post_ra>
// kernel: text_embedding_forward.35
= control target key start
LH: loop header
LB: loop body
LE: loop exit
PB: predicated region body
PF: predicated region fallthrough
CT: control target
= control target key end

     0   :  { %vm30_vm0 = vcmask 261120   ;;  %s204_s1 = inlined_call_operand.vmem [shape: f32[32,32], index: 1, kind: input, shape index: {}]   ;;  %s205_s0 = inlined_call_operand.vmem [shape: f32[16,32], index: 0, kind: input, shape index: {}]   ;;  %s206_s2 = inlined_call_operand.vmem [shape: f32[1,32], index: 2, kind: input, shape index: {}]   ;;  %s207_s3 = inlined_call_operand.vmem [shape: f32[16,32], index: 3, kind: input, shape index: {}]   ;;  %s208_s4 = inlined_call_operand.vmem [shape: f32[16,32], index: 4, kind: output, shape index: {}]  }
   0x1   :  { %v22_v0 = vld [vmem:[%s204_s1 + $0x18] sm:$0xff]  ;;  %v21_v1 = vld [vmem:[%s204_s1 + $0x10] sm:$0xff]  ;;  %v17_v2 = vld [vmem:[%s205_s0] sm:$0xff] }
   0x2   :  { %131 = vmatprep.subr.mxu0 %v22_v0  ;;  %v20_v3 = vld [vmem:[%s204_s1 + $0x8] sm:$0xff]  ;;  %139 = vmatprep.mubr.msk.f32.mxu0 %vm30_vm0, %v17_v2  ;;  %v19_v4 = vld [vmem:[%s204_s1] sm:$0xff] }
   0x3   :  { %132 = vmatpush3.msra.mxu0 %v22_v0  ;;  %v18_v5 = vld [vmem:[%s205_s0 + $0x8] sm:$0xff]  ;;  %v122_v6 = vld [vmem:[%s206_s2] ss:$0 sm:$0xff] }
   0x4   :  { %133 = vmatprep.subr.mxu0 %v21_v1  ;;  %v113_v8 = vld [vmem:[%s207_s3 + $0x8] sm:$0xff]  ;;  %v112_v11 = vld [vmem:[%s207_s3] sm:$0xff] }
   0x5   :  { %134 = vmatpush3.msra.mxu0 %v21_v1 }
   0x6   :  { %135 = vmatprep.subr.mxu0 %v20_v3 }
   0x7   :  { %136 = vmatpush3.msra.mxu0 %v20_v3 }
   0x8   :  { %137 = vmatprep.subr.mxu0 %v19_v4 }
   0x9   :  { %138 = vmatpush3.msra.mxu0 %v19_v4 }
   0xa   :  { %140 = vmatmul.mubr.msk.f32.vlgmr.msra.gmra.mxu0 %vm30_vm0, %v18_v5 }
  0xca   :  { %v141_v7 = vpop.f32.mrf.mxu0 }
  0xcb   :  { %v109_v9 = vadd.f32 %v141_v7, %v122_v6 }
  0xcc   :  { %v103_v10 = vpop.f32.mrf.mxu0 }
  0xcd   :  { %v115_v12 = vadd.f32 %v113_v8, %v109_v9  ;;  %v104_v13 = vadd.f32 %v122_v6, %v103_v10 }
  0xcf   :  { %117 = vst.msk [vmem:[%s208_s4 + $0x8] sm:$0xff] %vm30_vm0, %v115_v12  ;;  %v114_v14 = vadd.f32 %v112_v11, %v104_v13 }
  0xd1   :  { %116 = vst.msk [vmem:[%s208_s4] sm:$0xff] %vm30_vm0, %v114_v14 }

// kernel: text_embedding_forward.32
= control target key start
LH: loop header
LB: loop body
LE: loop exit
PB: predicated region body
PF: predicated region fallthrough
CT: control target
= control target key end

     0   :  { %vm25_vm0 = vcmask 130048   ;;  %vm117_vm1 = vcmask 261120   ;;  %s183_s1 = inlined_call_operand.vmem [shape: f32[16,32], index: 1, kind: input, shape index: {}]   ;;  %s184_s0 = inlined_call_operand.vmem [shape: f32[16,16], index: 0, kind: input, shape index: {}]   ;;  %s185_s2 = inlined_call_operand.vmem [shape: f32[1,32], index: 2, kind: input, shape index: {}]   ;;  %s186_s3 = inlined_call_operand.vmem [shape: f32[16,32], index: 3, kind: output, shape index: {}]  }
   0x1   :  { %v17_v0 = vld [vmem:[%s183_s1 + $0x8] sm:$0xff]  ;;  %v16_v1 = vld [vmem:[%s183_s1] sm:$0xff] }
   0x2   :  { %v14_v2 = vld [vmem:[%s184_s0] sm:$0xff]  ;;  %131 = vmatprep.subr.mxu0 %v17_v0  ;;  %v15_v3 = vld [vmem:[%s184_s0 + $0x8] sm:$0xff] }
   0x3   :  { %135 = vmatprep.mubr.msk.f32.mxu0 %vm25_vm0, %v14_v2  ;;  %132 = vmatpush3.msra.mxu0 %v17_v0  ;;  %v124_v4 = vld [vmem:[%s185_s2] ss:$0 sm:$0xff] }
   0x4   :  { %133 = vmatprep.subr.mxu0 %v16_v1 }
   0x5   :  { %134 = vmatpush3.msra.mxu0 %v16_v1 }
   0x6   :  { %136 = vmatmul.mubr.msk.f32.vlgmr.msra.gmra.mxu0 %vm25_vm0, %v15_v3 }
  0xc6   :  { %v137_v5 = vpop.f32.mrf.mxu0 }
  0xc7   :  { %v104_v6 = vadd.f32 %v137_v5, %v124_v4 }
  0xc8   :  { %v98_v7 = vpop.f32.mrf.mxu0 }
  0xc9   :  { %v110_v8 = vmul.f32 0.70710677, %v104_v6  ;;  %v99_v9 = vadd.f32 %v124_v4, %v98_v7  ;;  %v108_v12 = vmul.f32 0.5, %v104_v6 }
  0xcb   :  { %138 = verf.f32 %v110_v8  ;;  %v109_v10 = vmul.f32 0.70710677, %v99_v9  ;;  %v107_v16 = vmul.f32 0.5, %v99_v9 }
  0xcd   :  { %140 = verf.f32 %v109_v10 }
  0xd8   :  { %v139_v11 = vpop.eup %138 }
  0xd9   :  { %v114_v13 = vadd.f32 1.0, %v139_v11 }
  0xda   :  { %v141_v14 = vpop.eup %140 }
  0xdb   :  { %v116_v15 = vmul.f32 %v114_v13, %v108_v12  ;;  %v113_v17 = vadd.f32 1.0, %v141_v14 }
  0xdd   :  { %119 = vst.msk [vmem:[%s186_s3 + $0x8] sm:$0xff] %vm117_vm1, %v116_v15  ;;  %v115_v18 = vmul.f32 %v113_v17, %v107_v16 }
  0xdf   :  { %118 = vst.msk [vmem:[%s186_s3] sm:$0xff] %vm117_vm1, %v115_v18 }

// kernel: text_embedding_forward.33
= control target key start
LH: loop header
LB: loop body
LE: loop exit
PB: predicated region body
PF: predicated region fallthrough
CT: control target
= control target key end

     0   :  { %vm22_vm0 = vcmask 261120   ;;  %vm160_vm1 = vcmask 785408   ;;  %s262_s0 = inlined_call_operand.vmem [shape: f32[16,32], index: 0, kind: input, shape index: {}]   ;;  %s263_s3 = inlined_call_operand.vmem [shape: f32[32,96], index: 3, kind: input, shape index: {}]   ;;  %s264_s1 = inlined_call_operand.vmem [shape: f32[1,32], index: 1, kind: input, shape index: {}]   ;;  %s265_s2 = inlined_call_operand.vmem [shape: f32[1,32], index: 2, kind: input, shape index: {}]   ;;  %s266_s4 = inlined_call_operand.vmem [shape: f32[1,96], index: 4, kind: input, shape index: {}]   ;;  %s267_s5 = inlined_call_operand.vmem [shape: f32[16,96], index: 5, kind: output, shape index: {}]  }
   0x1   :  { %v20_v0 = vld [vmem:[%s262_s0] sm:$0xff]  ;;  %v21_v1 = vld [vmem:[%s262_s0 + $0x8] sm:$0xff]  ;;  %v71_v14 = vld [vmem:[%s263_s3 + $0x18] sm:$0xff] }
   0x2   :  { %v23_v2 = vsel %vm22_vm0, %v20_v0, 0.0  ;;  %v26_v3 = vsel %vm22_vm0, %v21_v1, 0.0  ;;  %v70_v15 = vld [vmem:[%s263_s3 + $0x10] sm:$0xff]  ;;  %178 = vmatprep.subr.mxu0 %v71_v14  ;;  %v69_v16 = vld [vmem:[%s263_s3 + $0x8] sm:$0xff]  ;;  %v68_v17 = vld [vmem:[%s263_s3] sm:$0xff] }
   0x3   :  { %24 = vadd.xlane.f32.xlu0 %v23_v2  ;;  %179 = vmatpush3.msra.mxu0 %v71_v14  ;;  %v167_v25 = vld [vmem:[%s264_s1] ss:$0 sm:$0xff] }
   0x4   :  { %180 = vmatprep.subr.mxu0 %v70_v15  ;;  %v168_v27 = vld [vmem:[%s265_s2] ss:$0 sm:$0xff] }
   0x5   :  { %181 = vmatpush3.msra.mxu0 %v70_v15  ;;  %v169_v34 = vld [vmem:[%s266_s4] ss:$0 sm:$0xff] }
   0x6   :  { %182 = vmatprep.subr.mxu0 %v69_v16 }
   0x7   :  { %27 = vadd.xlane.f32.xlu0 %v26_v3  ;;  %183 = vmatpush3.msra.mxu0 %v69_v16 }
   0x8   :  { %184 = vmatprep.subr.mxu0 %v68_v17 }
   0x9   :  { %185 = vmatpush3.msra.mxu0 %v68_v17 }
  0x8c   :  { %v25_v4 = vpop.xlane.xlu0 %24 }
  0x8d   :  { %v30_v5 = vmul.f32 0.03125, %v25_v4 }
  0x8f   :  { %v32_v6 = vsub.f32 %v20_v0, %v30_v5 }
  0x90   :  { %v28_v7 = vpop.xlane.xlu0 %27 }
  0x91   :  { %v31_v8 = vmul.f32 0.03125, %v28_v7  ;;  %v34_v9 = vmul.f32 %v32_v6, %v32_v6 }
  0x93   :  { %v33_v10 = vsub.f32 %v21_v1, %v31_v8  ;;  %v36_v11 = vsel %vm22_vm0, %v34_v9, 0.0 }
  0x94   :  { %37 = vadd.xlane.f32.xlu1 %v36_v11 }
  0x95   :  { %v35_v12 = vmul.f32 %v33_v10, %v33_v10 }
  0x97   :  { %v39_v13 = vsel %vm22_vm0, %v35_v12, 0.0 }
  0x98   :  { %40 = vadd.xlane.f32.xlu1 %v39_v13 }
 0x11d   :  { %v38_v18 = vpop.xlane.xlu1 %37 }
 0x11e   :  { %v42_v19 = vmul.f32 0.03125, %v38_v18 }
 0x120   :  { %v44_v20 = vadd.f32 1e-05, %v42_v19 }
 0x121   :  { %v41_v21 = vpop.xlane.xlu1 %40 }
 0x122   :  { %189 = vrsqrt.f32 %v44_v20  ;;  %v43_v22 = vmul.f32 0.03125, %v41_v21 }
 0x124   :  { %v45_v23 = vadd.f32 1e-05, %v43_v22 }
 0x126   :  { %191 = vrsqrt.f32 %v45_v23 }
 0x12f   :  { %v190_v24 = vpop.eup %189 }
 0x130   :  { %v48_v26 = vmul.f32 %v190_v24, %v32_v6 }
 0x132   :  { %v57_v28 = vmul.f32 %v167_v25, %v48_v26 }
 0x133   :  { %v192_v29 = vpop.eup %191 }
 0x134   :  { %v49_v30 = vmul.f32 %v192_v29, %v33_v10  ;;  %v66_v31 = vadd.f32 %v168_v27, %v57_v28 }
 0x136   :  { %v58_v32 = vmul.f32 %v167_v25, %v49_v30  ;;  %186 = vmatprep.mubr.msk.f32.mxu0 %vm22_vm0, %v66_v31 }
 0x138   :  { %v67_v33 = vadd.f32 %v168_v27, %v58_v32 }
 0x13a   :  { %187 = vmatmul.mubr.msk.f32.vlgmr.msra.gmra.mxu0 %vm22_vm0, %v67_v33 }
 0x1fa   :  { %v188_v35 = vpop.f32.mrf.mxu0 }
 0x1fb   :  { %v157_v36 = vadd.f32 %v188_v35, %v169_v34 }
 0x1fc   :  { %v151_v37 = vpop.f32.mrf.mxu0 }
 0x1fd   :  { %162 = vst.msk [vmem:[%s267_s5 + $0x8] sm:$0xff] %vm160_vm1, %v157_v36  ;;  %v152_v38 = vadd.f32 %v169_v34, %v151_v37 }
 0x1ff   :  { %161 = vst.msk [vmem:[%s267_s5] sm:$0xff] %vm160_vm1, %v152_v38 }

// kernel: text_embedding_forward.34
= control target key start
LH: loop header
LB: loop body
LE: loop exit
PB: predicated region body
PF: predicated region fallthrough
CT: control target
= control target key end

     0   :  { %s1161_s15 = smov 0   ;;  %s1245_s0 = inlined_call_operand.vmem [shape: f32[2,4,8,8], index: 0, kind: input, shape index: {}]   ;;  %s1246_s1 = inlined_call_operand.vmem [shape: f32[2,4,8,8], index: 1, kind: input, shape index: {}]   ;;  %s1247_s2 = inlined_call_operand.vmem [shape: f32[2,4,8,8], index: 2, kind: input, shape index: {}]   ;;  %s1248_s3 = inlined_call_operand.vmem [shape: f32[2,1,8], index: 3, kind: input, shape index: {}]   ;;  %s1249_s4 = inlined_call_operand.vmem [shape: f32[2,4,8,8], index: 4, kind: output, shape index: {}]  }
   0x1 LB: > { %s1012_s16 = sadd.s32 4294967295, %s1132_s15   ;;  %p1016_p0 = scmp.ge.s32.totalorder %s1132_s15, 1  ;;  %s1132_s15 = sphi %s1161_s15, %s14_s15  }
   0x2   : > { %p190_p1 = scmp.lt.s32.totalorder %s1132_s15, 3 }
   0x4   : > { %p191_p2 = pnand %p1016_p0, %p190_p1 }
   0x5   : > { %p229_p3 = scmp.lt.s32.totalorder (!%p191_p2), %s1012_s16, 1 }
   0x6   : > { %194 = sbr.rel (%p191_p2) target bundleno = 730 (0x2da), region = 36 }
   0xb   : > { %v1134_v0 = vmov 0.0   ;;  %vm1135_vm0 = vmmov 0   ;;  %s1251_s16 = smov (!%p229_p3, %s1012_s16), 1  ;;  %vm264_vm1 = vcmask 64512  }
   0xc   : > { %1060 = vmatprep.subr.mxu0 %v1134_v0  ;;  %1062 = vmatprep.mubr.msk.f32.mxu0 %vm1135_vm0, %v1134_v0  ;;  %s1178_s17 = sshll.u32 %s1251_s16, 5  ;;  %s246_s26 = scalar_lea.vmem %s1248_s3, %s1251_s16 }
   0xd   : > { %1065 = vmatprep.subr.mxu1 %v1134_v0  ;;  %1067 = vmatprep.mubr.msk.f32.mxu1 %vm1135_vm0, %v1134_v0  ;;  %s238_s20 = scalar_lea.vmem %s1246_s1, %s1178_s17  ;;  %s233_s23 = scalar_lea.vmem %s1245_s0, %s1178_s17  ;;  %v1033_v11 = vld [vmem:[%s246_s26] ss:$0 sm:$0xff] }
   0xe   : > { %v256_v1 = vld [vmem:[%s238_s20] sm:$0xff]  ;;  %v257_v2 = vld [vmem:[%s238_s20 + $0x8] sm:$0xff]  ;;  %v258_v5 = vld [vmem:[%s238_s20 + $0x10] sm:$0xff]  ;;  %s243_s29 = scalar_lea.vmem %s1247_s2, %s1178_s17  ;;  %s251_s6 = scalar_lea.vmem %s1249_s4, %s1178_s17 }
   0xf   : > { %1061 = vmatpush3.xpose.msk.msra.mxu0 %vm264_vm1, %v256_v1  ;;  %v252_v3 = vld [vmem:[%s233_s23] sm:$0xff]  ;;  %1066 = vmatpush3.xpose.msk.msra.mxu1 %vm264_vm1, %v257_v2  ;;  %v253_v4 = vld [vmem:[%s233_s23 + $0x8] sm:$0xff]  ;;  %v259_v6 = vld [vmem:[%s238_s20 + $0x18] sm:$0xff] }
  0x10   : > { %1070 = vmatprep.subr.mxu0 %v1134_v0  ;;  %1075 = vmatprep.subr.mxu1 %v1134_v0  ;;  %v254_v7 = vld [vmem:[%s233_s23 + $0x10] sm:$0xff]  ;;  %v255_v8 = vld [vmem:[%s233_s23 + $0x18] sm:$0xff]  ;;  %v260_v50 = vld [vmem:[%s243_s29] sm:$0xff] }
  0x11   : > { %v261_v51 = vld [vmem:[%s243_s29 + $0x8] sm:$0xff]  ;;  %v262_v58 = vld [vmem:[%s243_s29 + $0x10] sm:$0xff]  ;;  %v263_v62 = vld [vmem:[%s243_s29 + $0x18] sm:$0xff] }
  0x12   : > { %1063 = vmatmul.mubr.msk.f32.vlgmr.msra.gmra.mxu0 %vm264_vm1, %v252_v3  ;;  %1068 = vmatmul.mubr.msk.f32.vlgmr.msra.gmra.mxu1 %vm264_vm1, %v253_v4 }
  0x13   : > { %1071 = vmatpush3.xpose.msk.msra.mxu0 %vm264_vm1, %v258_v5  ;;  %1072 = vmatprep.mubr.msk.f32.mxu0 %vm1135_vm0, %v1134_v0 }
  0x14   : > { %1076 = vmatpush3.xpose.msk.msra.mxu1 %vm264_vm1, %v259_v6  ;;  %1077 = vmatprep.mubr.msk.f32.mxu1 %vm1135_vm0, %v1134_v0 }
  0x15   : > { %1080 = vmatprep.subr.mxu0 %v1134_v0  ;;  %1085 = vmatprep.subr.mxu1 %v1134_v0 }
  0x16   : > { %1073 = vmatmul.mubr.msk.f32.vlgmr.msra.gmra.mxu0 %vm264_vm1, %v254_v7 }
  0x17   : > { %1078 = vmatmul.mubr.msk.f32.vlgmr.msra.gmra.mxu1 %vm264_vm1, %v255_v8  ;;  %1082 = vmatprep.mubr.msk.f32.mxu0 %vm1135_vm0, %v1134_v0 }
  0x18   : > { %1087 = vmatprep.mubr.msk.f32.mxu1 %vm1135_vm0, %v1134_v0  ;;  %1081 = vmatpush3.msra.mxu0 %v260_v50 }
  0x19   : > { %1090 = vmatprep.subr.mxu0 %v1134_v0  ;;  %1086 = vmatpush3.msra.mxu1 %v261_v51 }
  0x1a   : > { %1095 = vmatprep.subr.mxu1 %v1134_v0 }
  0xd2   : > { %v337_v9 = vpop.f32.mrf.mxu0  ;;  %v413_v10 = vpop.f32.mrf.mxu1 }
  0xd3   : > { %v569_v12 = vmul.f32 0.35355338, %v337_v9  ;;  %v570_v13 = vmul.f32 0.35355338, %v413_v10 }
  0xd4   : > { %v1064_v14 = vpop.f32.mrf.mxu0  ;;  %v1069_v15 = vpop.f32.mrf.mxu1 }
  0xd5   : > { %v580_v16 = vadd.f32 %v1033_v11, %v569_v12  ;;  %v581_v17 = vadd.f32 %v1033_v11, %v570_v13 }
  0xd6   : > { %v489_v18 = vpop.f32.mrf.mxu0 }
  0xd7   : > { %v571_v19 = vmul.f32 0.35355338, %v489_v18  ;;  %v584_v20 = vsel %vm264_vm1, %v580_v16, -inf  ;;  %v565_v21 = vpop.f32.mrf.mxu1  ;;  %v587_v25 = vsel %vm264_vm1, %v581_v17, -inf }
  0xd8   : > { %585 = vmax.xlane.f32.xlu0 %v584_v20  ;;  %v1074_v22 = vpop.f32.mrf.mxu0  ;;  %v572_v23 = vmul.f32 0.35355338, %v565_v21 }
  0xd9   : > { %v1079_v24 = vpop.f32.mrf.mxu1  ;;  %v582_v26 = vadd.f32 %v1033_v11, %v571_v19 }
  0xda   : > { %v583_v27 = vadd.f32 %v1033_v11, %v572_v23 }
  0xdb   : > { %v590_v28 = vsel %vm264_vm1, %v582_v26, -inf }
  0xdc   : > { %588 = vmax.xlane.f32.xlu0 %v587_v25  ;;  %591 = vmax.xlane.f32.xlu1 %v590_v28  ;;  %v593_v29 = vsel %vm264_vm1, %v583_v27, -inf }
  0xe0   : > { %594 = vmax.xlane.f32.xlu1 %v593_v29 }
 0x161   : > { %v586_v30 = vpop.xlane.xlu0 %585 }
 0x162   : > { %v596_v31 = vsub.f32 %v580_v16, %v586_v30 }
 0x164   : > { %v600_v32 = vmul.f32 1.442695, %v596_v31 }
 0x165   : > { %v589_v33 = vpop.xlane.xlu0 %588  ;;  %v592_v34 = vpop.xlane.xlu1 %591 }
 0x166   : > { %1110 = vpow2.f32 %v600_v32  ;;  %v597_v35 = vsub.f32 %v581_v17, %v589_v33  ;;  %v598_v36 = vsub.f32 %v582_v26, %v592_v34 }
 0x168   : > { %v602_v37 = vmul.f32 1.442695, %v597_v35  ;;  %v604_v38 = vmul.f32 1.442695, %v598_v36 }
 0x169   : > { %v595_v39 = vpop.xlane.xlu1 %594 }
 0x16a   : > { %1112 = vpow2.f32 %v602_v37  ;;  %v599_v40 = vsub.f32 %v583_v27, %v595_v39 }
 0x16b   : > { %1114 = vpow2.f32 %v604_v38 }
 0x16c   : > { %v606_v41 = vmul.f32 1.442695, %v599_v40 }
 0x16e   : > { %1116 = vpow2.f32 %v606_v41 }
 0x173   : > { %v1111_v42 = vpop.eup %1110 }
 0x174   : > { %v608_v43 = vsel %vm264_vm1, %v1111_v42, 0.0 }
 0x175   : > { %609 = vadd.xlane.f32.xlu0 %v608_v43 }
 0x177   : > { %v1113_v44 = vpop.eup %1112 }
 0x178   : > { %v1115_v45 = vpop.eup %1114  ;;  %v611_v46 = vsel %vm264_vm1, %v1113_v44, 0.0 }
 0x179   : > { %612 = vadd.xlane.f32.xlu1 %v611_v46  ;;  %v614_v47 = vsel %vm264_vm1, %v1115_v45, 0.0 }
 0x17a   : > { %615 = vadd.xlane.f32.xlu0 %v614_v47 }
 0x17b   : > { %v1117_v48 = vpop.eup %1116 }
 0x17c   : > { %v617_v49 = vsel %vm264_vm1, %v1117_v48, 0.0 }
 0x17d   : > { %618 = vadd.xlane.f32.xlu1 %v617_v49 }
 0x1fe   : > { %v610_v52 = vpop.xlane.xlu0 %609 }
 0x1ff   : > { %1118 = vrcp.f32 %v610_v52 }
 0x202   : > { %v613_v53 = vpop.xlane.xlu1 %612 }
 0x203   : > { %v616_v54 = vpop.xlane.xlu0 %615  ;;  %1120 = vrcp.f32 %v613_v53 }
 0x204   : > { %1122 = vrcp.f32 %v616_v54 }
 0x206   : > { %v619_v55 = vpop.xlane.xlu1 %618 }
 0x207   : > { %1124 = vrcp.f32 %v619_v55 }
 0x20c   : > { %v1119_v56 = vpop.eup %1118 }
 0x20d   : > { %v624_v57 = vmul.f32 %v1119_v56, %v1111_v42 }
 0x20f   : > { %1083 = vmatmul.mubr.msk.f32.vlgmr.msra.gmra.mxu0 %vm264_vm1, %v624_v57 }
 0x210   : > { %v1121_v59 = vpop.eup %1120  ;;  %1091 = vmatpush3.msra.mxu0 %v262_v58  ;;  %1092 = vmatprep.mubr.msk.f32.mxu0 %vm1135_vm0, %v1134_v0 }
 0x211   : > { %v1123_v60 = vpop.eup %1122  ;;  %v625_v61 = vmul.f32 %v1121_v59, %v1113_v44 }
 0x212   : > { %v626_v63 = vmul.f32 %v1123_v60, %v1115_v45 }
 0x213   : > { %1088 = vmatmul.mubr.msk.f32.vlgmr.msra.gmra.mxu1 %vm264_vm1, %v625_v61 }
 0x214   : > { %v1125_v1 = vpop.eup %1124  ;;  %1093 = vmatmul.mubr.msk.f32.vlgmr.msra.gmra.mxu0 %vm264_vm1, %v626_v63  ;;  %1096 = vmatpush3.msra.mxu1 %v263_v62 }
 0x215   : > { %1097 = vmatprep.mubr.msk.f32.mxu1 %vm1135_vm0, %v1134_v0  ;;  %v627_v2 = vmul.f32 %v1125_v1, %v1117_v48 }
 0x217   : > { %1098 = vmatmul.mubr.msk.f32.vlgmr.msra.gmra.mxu1 %vm264_vm1, %v627_v2 }
 0x2cf   : > { %v697_v3 = vpop.f32.mrf.mxu0 }
 0x2d0   : > { %920 = vst.msk [vmem:[%s251_s6] sm:$0xff] %vm264_vm1, %v697_v3 }
 0x2d1   : > { %v1084_v4 = vpop.f32.mrf.mxu0 }
 0x2d3   : > { %v770_v5 = vpop.f32.mrf.mxu1 }
 0x2d4   : > { %921 = vst.msk [vmem:[%s251_s6 + $0x8] sm:$0xff] %vm264_vm1, %v770_v5  ;;  %v843_v6 = vpop.f32.mrf.mxu0 }
 0x2d5   : > { %922 = vst.msk [vmem:[%s251_s6 + $0x10] sm:$0xff] %vm264_vm1, %v843_v6  ;;  %v1089_v7 = vpop.f32.mrf.mxu1 }
 0x2d6   : > { %v1094_v8 = vpop.f32.mrf.mxu0 }
 0x2d7   : > { %v916_v0 = vpop.f32.mrf.mxu1 }
 0x2d8   : > { %923 = vst.msk [vmem:[%s251_s6 + $0x18] sm:$0xff] %vm264_vm1, %v916_v0 }
 0x2d9   : > { %v1099_v9 = vpop.f32.mrf.mxu1 }
 0x2da PF: > { %s14_s15 = sadd.s32 1, %s1132_s15  }
 0x2db   : > { %p11_p4 = scmp.ge.s32.totalorder %s14_s15, 4  }
 0x2dd   :  { %13 = sbr.rel (!%p11_p4) target bundleno = 1 (0x1), region = 75 }

// kernel: text_embedding_forward.37
= control target key start
LH: loop header
LB: loop body
LE: loop exit
PB: predicated region body
PF: predicated region fallthrough
CT: control target
= control target key end

     0   :  { %vm121_vm0 = vcmask 261120   ;;  %s276_s1 = inlined_call_operand.vmem [shape: f32[128,32], index: 1, kind: input, shape index: {}]   ;;  %s277_s0 = inlined_call_operand.vmem [shape: f32[16,128], index: 0, kind: input, shape index: {}]   ;;  %s278_s2 = inlined_call_operand.vmem [shape: f32[1,32], index: 2, kind: input, shape index: {}]   ;;  %s279_s3 = inlined_call_operand.vmem [shape: f32[16,32], index: 3, kind: input, shape index: {}]   ;;  %s280_s4 = inlined_call_operand.vmem [shape: f32[16,32], index: 4, kind: output, shape index: {}]  }
   0x1   :  { %v34_v0 = vld [vmem:[%s276_s1 + $0x78] sm:$0xff]  ;;  %v33_v1 = vld [vmem:[%s276_s1 + $0x70] sm:$0xff]  ;;  %v32_v2 = vld [vmem:[%s276_s1 + $0x68] sm:$0xff] }
   0x2   :  { %147 = vmatprep.subr.mxu0 %v34_v0  ;;  %v31_v3 = vld [vmem:[%s276_s1 + $0x60] sm:$0xff]  ;;  %v30_v5 = vld [vmem:[%s276_s1 + $0x58] sm:$0xff]  ;;  %v29_v6 = vld [vmem:[%s276_s1 + $0x50] sm:$0xff] }
   0x3   :  { %148 = vmatpush3.msra.mxu0 %v34_v0  ;;  %v17_v4 = vld [vmem:[%s277_s0] sm:$0xff]  ;;  %v28_v7 = vld [vmem:[%s276_s1 + $0x48] sm:$0xff]  ;;  %v26_v9 = vld [vmem:[%s276_s1 + $0x38] sm:$0xff] }
   0x4   :  { %149 = vmatprep.subr.mxu0 %v33_v1  ;;  %179 = vmatprep.mubr.f32.mxu0 %v17_v4  ;;  %v27_v8 = vld [vmem:[%s276_s1 + $0x40] sm:$0xff]  ;;  %v25_v10 = vld [vmem:[%s276_s1 + $0x30] sm:$0xff]  ;;  %v24_v11 = vld [vmem:[%s276_s1 + $0x28] sm:$0xff] }
   0x5   :  { %150 = vmatpush3.msra.mxu0 %v33_v1  ;;  %v23_v12 = vld [vmem:[%s276_s1 + $0x20] sm:$0xff]  ;;  %v22_v13 = vld [vmem:[%s276_s1 + $0x18] sm:$0xff]  ;;  %v21_v14 = vld [vmem:[%s276_s1 + $0x10] sm:$0xff] }
   0x6   :  { %151 = vmatprep.subr.mxu0 %v32_v2  ;;  %v20_v15 = vld [vmem:[%s276_s1 + $0x8] sm:$0xff]  ;;  %v19_v16 = vld [vmem:[%s276_s1] sm:$0xff] }
   0x7   :  { %152 = vmatpush3.msra.mxu0 %v32_v2  ;;  %v18_v17 = vld [vmem:[%s277_s0 + $0x8] sm:$0xff]  ;;  %v128_v18 = vld [vmem:[%s278_s2] ss:$0 sm:$0xff] }
   0x8   :  { %153 = vmatprep.subr.mxu0 %v31_v3  ;;  %v118_v20 = vld [vmem:[%s279_s3 + $0x8] sm:$0xff]  ;;  %v117_v23 = vld [vmem:[%s279_s3] sm:$0xff] }
   0x9   :  { %154 = vmatpush3.msra.mxu0 %v31_v3 }
   0xa   :  { %155 = vmatprep.subr.mxu0 %v30_v5 }
   0xb   :  { %156 = vmatpush3.msra.mxu0 %v30_v5 }
   0xc   :  { %157 = vmatprep.subr.mxu0 %v29_v6 }
   0xd   :  { %158 = vmatpush3.msra.mxu0 %v29_v6 }
   0xe   :  { %159 = vmatprep.subr.mxu0 %v28_v7 }
   0xf   :  { %160 = vmatpush3.msra.mxu0 %v28_v7 }
  0x10   :  { %161 = vmatprep.subr.mxu0 %v27_v8 }
  0x11   :  { %162 = vmatpush3.msra.mxu0 %v27_v8 }
  0x12   :  { %163 = vmatprep.subr.mxu0 %v26_v9 }
  0x13   :  { %164 = vmatpush3.msra.mxu0 %v26_v9 }
  0x14   :  { %165 = vmatprep.subr.mxu0 %v25_v10 }
  0x15   :  { %166 = vmatpush3.msra.mxu0 %v25_v10 }
  0x16   :  { %167 = vmatprep.subr.mxu0 %v24_v11 }
  0x17   :  { %168 = vmatpush3.msra.mxu0 %v24_v11 }
  0x18   :  { %169 = vmatprep.subr.mxu0 %v23_v12 }
  0x19   :  { %170 = vmatpush3.msra.mxu0 %v23_v12 }
  0x1a   :  { %171 = vmatprep.subr.mxu0 %v22_v13 }
  0x1b   :  { %172 = vmatpush3.msra.mxu0 %v22_v13 }
  0x1c   :  { %173 = vmatprep.subr.mxu0 %v21_v14 }
  0x1d   :  { %174 = vmatpush3.msra.mxu0 %v21_v14 }
  0x1e   :  { %175 = vmatprep.subr.mxu0 %v20_v15 }
  0x1f   :  { %176 = vmatpush3.msra.mxu0 %v20_v15 }
  0x20   :  { %177 = vmatprep.subr.mxu0 %v19_v16 }
  0x21   :  { %178 = vmatpush3.msra.mxu0 %v19_v16 }
  0x22   :  { %180 = vmatmul.mubr.f32.vlgmr.msra.gmra.mxu0 %v18_v17 }
  0xe2   :  { %v181_v19 = vpop.f32.mrf.mxu0 }
  0xe3   :  { %v114_v21 = vadd.f32 %v181_v19, %v128_v18 }
  0xe4   :  { %v108_v22 = vpop.f32.mrf.mxu0 }
  0xe5   :  { %v120_v24 = vadd.f32 %v118_v20, %v114_v21  ;;  %v109_v25 = vadd.f32 %v128_v18, %v108_v22 }
  0xe7   :  { %123 = vst.msk [vmem:[%s280_s4 + $0x8] sm:$0xff] %vm121_vm0, %v120_v24  ;;  %v119_v26 = vadd.f32 %v117_v23, %v109_v25 }
  0xe9   :  { %122 = vst.msk [vmem:[%s280_s4] sm:$0xff] %vm121_vm0, %v119_v26 }

// kernel: text_embedding_forward.63
= control target key start
LH: loop header
LB: loop body
LE: loop exit
PB: predicated region body
PF: predicated region fallthrough
CT: control target
= control target key end

     0   :  { %vm17_vm0 = vcmask 261120   ;;  %s156_s0 = inlined_call_operand.vmem [shape: f32[16,32], index: 0, kind: input, shape index: {}]   ;;  %s157_s1 = inlined_call_operand.vmem [shape: f32[1,32], index: 1, kind: input, shape index: {}]   ;;  %s158_s2 = inlined_call_operand.vmem [shape: f32[1,32], index: 2, kind: input, shape index: {}]   ;;  %s159_s3 = inlined_call_operand.hbm [shape: f32[16,32], index: 3, kind: output, shape index: {}]  }
   0x1   :  { %v15_v0 = vld [vmem:[%s156_s0] sm:$0xff]  ;;  %v16_v1 = vld [vmem:[%s156_s0 + $0x8] sm:$0xff] }
   0x2   :  { %8 = vsyncpa [#allocation3], 0  ;;  %v18_v2 = vsel %vm17_vm0, %v15_v0, 0.0  ;;  %v21_v3 = vsel %vm17_vm0, %v16_v1, 0.0  ;;  %v81_v21 = vld [vmem:[%s157_s1] ss:$0 sm:$0xff] }
   0x3   :  { %19 = vadd.xlane.f32.xlu0 %v18_v2  ;;  %v82_v23 = vld [vmem:[%s158_s2] ss:$0 sm:$0xff]  ;;  %s112_s19 = smov [#allocation2]  }
   0x4   :  { %s70_s20 = sshll.u32 %s112_s19, 4  ;;  %s71_s20 = int_to_ptr.vmem [resolvable:$true] %s70_s20 }
   0x5   :  { %s90_s21 = scalar_lea.vmem %s71_s20, 256  ;;  %p95_p1 = scmp.lt.s32.totalorder %s71_s20, %s71_s20 }
   0x6   :  { %p91_p0 = scmp.ne.s32.totalorder %s71_s20, %s90_s21  ;;  %p96_p2 = scmp.lt.s32.totalorder %s90_s21, %s90_s21 }
   0x7   :  { %22 = vadd.xlane.f32.xlu0 %v21_v3 }
   0x8   :  { %p97_p3 = por %p96_p2, %p95_p1 }
   0xa   :  { %p98_p4 = pnand %p97_p3, %p91_p0 }
  0x8c   :  { %v20_v4 = vpop.xlane.xlu0 %19 }
  0x8d   :  { %v25_v5 = vmul.f32 0.03125, %v20_v4 }
  0x8f   :  { %v27_v6 = vsub.f32 %v15_v0, %v25_v5 }
  0x90   :  { %v23_v7 = vpop.xlane.xlu0 %22 }
  0x91   :  { %v26_v8 = vmul.f32 0.03125, %v23_v7  ;;  %v29_v9 = vmul.f32 %v27_v6, %v27_v6 }
  0x93   :  { %v28_v10 = vsub.f32 %v16_v1, %v26_v8  ;;  %v31_v11 = vsel %vm17_vm0, %v29_v9, 0.0 }
  0x94   :  { %32 = vadd.xlane.f32.xlu1 %v31_v11 }
  0x95   :  { %v30_v12 = vmul.f32 %v28_v10, %v28_v10 }
  0x97   :  { %v34_v13 = vsel %vm17_vm0, %v30_v12, 0.0 }
  0x98   :  { %35 = vadd.xlane.f32.xlu1 %v34_v13 }
 0x11d   :  { %v33_v14 = vpop.xlane.xlu1 %32 }
 0x11e   :  { %v37_v15 = vmul.f32 0.03125, %v33_v14 }
 0x120   :  { %v39_v16 = vadd.f32 1e-05, %v37_v15 }
 0x121   :  { %v36_v17 = vpop.xlane.xlu1 %35 }
 0x122   :  { %86 = vrsqrt.f32 %v39_v16  ;;  %v38_v18 = vmul.f32 0.03125, %v36_v17 }
 0x124   :  { %v40_v19 = vadd.f32 1e-05, %v38_v18 }
 0x126   :  { %88 = vrsqrt.f32 %v40_v19 }
 0x12f   :  { %v87_v20 = vpop.eup %86 }
 0x130   :  { %v43_v22 = vmul.f32 %v87_v20, %v27_v6 }
 0x132   :  { %v52_v24 = vmul.f32 %v81_v21, %v43_v22 }
 0x133   :  { %v89_v25 = vpop.eup %88 }
 0x134   :  { %v44_v26 = vmul.f32 %v89_v25, %v28_v10  ;;  %v61_v27 = vadd.f32 %v82_v23, %v52_v24 }
 0x136   :  { %v53_v28 = vmul.f32 %v81_v21, %v44_v26  ;;  %63 = vst.msk [vmem:[#allocation2] sm:$0xff] %vm17_vm0, %v61_v27 }
 0x138   :  { %v62_v29 = vadd.f32 %v82_v23, %v53_v28 }
 0x13a   :  { %64 = vst.msk [vmem:[#allocation2 + $0x8] sm:$0xff] %vm17_vm0, %v62_v29 }
 0x13b   :  { %101 = shalt.err (!%p98_p4)
}
 0x13c   :  { %s113_s1 = smov 128   ;;  %s114_s2 = smov 8  }
 0x13d   :  { %76 = dma.vmem_to_hbm [thread:$0]  %s71_s20, 256, %s159_s3, [#allocation3], %s113_s1, %s113_s1, %s114_s2  }
 0x13e   :  { %110 = dma.done.wait [#allocation3], 256  }
 0x13f   :  { %111 = vsyncadd [#allocation3], 4294967040 }
 0x140   :  { %80 = vsyncpa [#allocation3], 1 }

// kernel: text_embedding_forward.36
= control target key start
LH: loop header
LB: loop body
LE: loop exit
PB: predicated region body
PF: predicated region fallthrough
CT: control target
= control target key end

     0   :  { %vm22_vm0 = vcmask 261120   ;;  %s275_s0 = inlined_call_operand.vmem [shape: f32[16,32], index: 0, kind: input, shape index: {}]   ;;  %s276_s3 = inlined_call_operand.vmem [shape: f32[32,128], index: 3, kind: input, shape index: {}]   ;;  %s277_s1 = inlined_call_operand.vmem [shape: f32[1,32], index: 1, kind: input, shape index: {}]   ;;  %s278_s2 = inlined_call_operand.vmem [shape: f32[1,32], index: 2, kind: input, shape index: {}]   ;;  %s279_s4 = inlined_call_operand.vmem [shape: f32[1,128], index: 4, kind: input, shape index: {}]   ;;  %s280_s5 = inlined_call_operand.vmem [shape: f32[16,128], index: 5, kind: output, shape index: {}]  }
   0x1   :  { %v20_v0 = vld [vmem:[%s275_s0] sm:$0xff]  ;;  %v21_v1 = vld [vmem:[%s275_s0 + $0x8] sm:$0xff]  ;;  %v71_v14 = vld [vmem:[%s276_s3 + $0x18] sm:$0xff] }
   0x2   :  { %v23_v2 = vsel %vm22_vm0, %v20_v0, 0.0  ;;  %v26_v3 = vsel %vm22_vm0, %v21_v1, 0.0  ;;  %v70_v15 = vld [vmem:[%s276_s3 + $0x10] sm:$0xff]  ;;  %187 = vmatprep.subr.mxu0 %v71_v14  ;;  %v69_v16 = vld [vmem:[%s276_s3 + $0x8] sm:$0xff]  ;;  %v68_v17 = vld [vmem:[%s276_s3] sm:$0xff] }
   0x3   :  { %24 = vadd.xlane.f32.xlu0 %v23_v2  ;;  %188 = vmatpush3.msra.mxu0 %v71_v14  ;;  %v176_v25 = vld [vmem:[%s277_s1] ss:$0 sm:$0xff] }
   0x4   :  { %189 = vmatprep.subr.mxu0 %v70_v15  ;;  %v177_v27 = vld [vmem:[%s278_s2] ss:$0 sm:$0xff] }
   0x5   :  { %190 = vmatpush3.msra.mxu0 %v70_v15  ;;  %v178_v34 = vld [vmem:[%s279_s4] ss:$0 sm:$0xff] }
   0x6   :  { %191 = vmatprep.subr.mxu0 %v69_v16 }
   0x7   :  { %27 = vadd.xlane.f32.xlu0 %v26_v3  ;;  %192 = vmatpush3.msra.mxu0 %v69_v16 }
   0x8   :  { %193 = vmatprep.subr.mxu0 %v68_v17 }
   0x9   :  { %194 = vmatpush3.msra.mxu0 %v68_v17 }
  0x8c   :  { %v25_v4 = vpop.xlane.xlu0 %24 }
  0x8d   :  { %v30_v5 = vmul.f32 0.03125, %v25_v4 }
  0x8f   :  { %v32_v6 = vsub.f32 %v20_v0, %v30_v5 }
  0x90   :  { %v28_v7 = vpop.xlane.xlu0 %27 }
  0x91   :  { %v31_v8 = vmul.f32 0.03125, %v28_v7  ;;  %v34_v9 = vmul.f32 %v32_v6, %v32_v6 }
  0x93   :  { %v33_v10 = vsub.f32 %v21_v1, %v31_v8  ;;  %v36_v11 = vsel %vm22_vm0, %v34_v9, 0.0 }
  0x94   :  { %37 = vadd.xlane.f32.xlu1 %v36_v11 }
  0x95   :  { %v35_v12 = vmul.f32 %v33_v10, %v33_v10 }
  0x97   :  { %v39_v13 = vsel %vm22_vm0, %v35_v12, 0.0 }
  0x98   :  { %40 = vadd.xlane.f32.xlu1 %v39_v13 }
 0x11d   :  { %v38_v18 = vpop.xlane.xlu1 %37 }
 0x11e   :  { %v42_v19 = vmul.f32 0.03125, %v38_v18 }
 0x120   :  { %v44_v20 = vadd.f32 1e-05, %v42_v19 }
 0x121   :  { %v41_v21 = vpop.xlane.xlu1 %40 }
 0x122   :  { %198 = vrsqrt.f32 %v44_v20  ;;  %v43_v22 = vmul.f32 0.03125, %v41_v21 }
 0x124   :  { %v45_v23 = vadd.f32 1e-05, %v43_v22 }
 0x126   :  { %200 = vrsqrt.f32 %v45_v23 }
 0x12f   :  { %v199_v24 = vpop.eup %198 }
 0x130   :  { %v48_v26 = vmul.f32 %v199_v24, %v32_v6 }
 0x132   :  { %v57_v28 = vmul.f32 %v176_v25, %v48_v26 }
 0x133   :  { %v201_v29 = vpop.eup %200 }
 0x134   :  { %v49_v30 = vmul.f32 %v201_v29, %v33_v10  ;;  %v66_v31 = vadd.f32 %v177_v27, %v57_v28 }
 0x136   :  { %v58_v32 = vmul.f32 %v176_v25, %v49_v30  ;;  %195 = vmatprep.mubr.msk.f32.mxu0 %vm22_vm0, %v66_v31 }
 0x138   :  { %v67_v33 = vadd.f32 %v177_v27, %v58_v32 }
 0x13a   :  { %196 = vmatmul.mubr.msk.f32.vlgmr.msra.gmra.mxu0 %vm22_vm0, %v67_v33 }
 0x1fa   :  { %v197_v35 = vpop.f32.mrf.mxu0 }
 0x1fb   :  { %v157_v36 = vadd.f32 %v197_v35, %v178_v34 }
 0x1fc   :  { %v151_v37 = vpop.f32.mrf.mxu0 }
 0x1fd   :  { %v163_v38 = vmul.f32 0.70710677, %v157_v36  ;;  %v152_v39 = vadd.f32 %v178_v34, %v151_v37  ;;  %v161_v42 = vmul.f32 0.5, %v157_v36 }
 0x1ff   :  { %202 = verf.f32 %v163_v38  ;;  %v162_v40 = vmul.f32 0.70710677, %v152_v39  ;;  %v160_v46 = vmul.f32 0.5, %v152_v39 }
 0x201   :  { %204 = verf.f32 %v162_v40 }
 0x20c   :  { %v203_v41 = vpop.eup %202 }
 0x20d   :  { %v167_v43 = vadd.f32 1.0, %v203_v41 }
 0x20e   :  { %v205_v44 = vpop.eup %204 }
 0x20f   :  { %v169_v45 = vmul.f32 %v167_v43, %v161_v42  ;;  %v166_v47 = vadd.f32 1.0, %v205_v44 }
 0x211   :  { %171 = vst [vmem:[%s280_s5 + $0x8] sm:$0xff] %v169_v45  ;;  %v168_v48 = vmul.f32 %v166_v47, %v160_v46 }
 0x213   :  { %170 = vst [vmem:[%s280_s5] sm:$0xff] %v168_v48 }

</bundles_post_ra>
